<compile_context>
chip_gen: v5e
topology: v5e:2x2
jax: 0.10.0
libtpu: 0.0.40
codegen_flags: <defaults>
</compile_context>

<pallas_src>
import functools

import jax
import jax.numpy as jnp
from jax import lax
from jax.experimental import pallas as pl
from jax.experimental.pallas import tpu as pltpu


def _round_up(x, m):
    return ((x + m - 1) // m) * m


def _pick_tile(dim, preferred=512):
    """Largest multiple of 128 <= preferred that divides dim (dim is a 128-mult)."""
    t = max(min(preferred, dim) - (min(preferred, dim) % 128), 128)
    while dim % t:
        t -= 128
    return t


def _pad2(x, rows, cols):
    return jnp.pad(x, ((0, rows - x.shape[0]), (0, cols - x.shape[1])))


# ----------------------------------------------------------------------------
# 1) fts kernel:  fts[s] = seq[s] @ W_gcn   (once per unique seq, resident W)
# ----------------------------------------------------------------------------
def _fts_kernel(seq_ref, w_ref, out_ref):
    out_ref[0] = jnp.dot(seq_ref[0], w_ref[...],
                         preferred_element_type=jnp.float32).astype(out_ref.dtype)


def compute_fts(seq_stack, w_gcn, *, tm):
    S, Np, Fp = seq_stack.shape
    Hp = w_gcn.shape[1]
    return pl.pallas_call(
        _fts_kernel,
        grid=(S, Np // tm),
        in_specs=[
            pl.BlockSpec((1, tm, Fp), lambda s, i: (s, i, 0)),
            pl.BlockSpec((Fp, Hp), lambda s, i: (0, 0)),       # VMEM-resident weight
        ],
        out_specs=pl.BlockSpec((1, tm, Hp), lambda s, i: (s, i, 0)),
        out_shape=jax.ShapeDtypeStruct((S, Np, Hp), jnp.bfloat16),
        compiler_params=pltpu.CompilerParams(
            dimension_semantics=("parallel", "parallel"),
            vmem_limit_bytes=32 * 1024 * 1024),
    )(seq_stack, w_gcn)


# ----------------------------------------------------------------------------
# 2) gcn_readout:  c[g] = sigmoid(mean_nodes(PReLU(adj @ fts + b)))   (c_1, c_3)
#    fts slab VMEM-resident per graph; full hidden matrix never written to HBM.
# ----------------------------------------------------------------------------
def _gcn_readout_kernel(adj_ref, fts_ref, b_ref, alpha_ref, c_ref, csum_ref,
                        *, n_true, tm):
    i = pl.program_id(1)

    @pl.when(i == 0)
    def _init():
        csum_ref[...] = jnp.zeros_like(csum_ref)

    z = jnp.dot(adj_ref[0], fts_ref[0], preferred_element_type=jnp.float32)
    z = z + b_ref[...]
    alpha = alpha_ref[0, 0]
    h = jnp.where(z > 0.0, z, alpha * z)                        # PReLU (f32)
    # mask zero-padded node rows (PReLU(0 + b) != 0) so the mean stays exact
    rows = lax.broadcasted_iota(jnp.int32, (tm, 1), 0) + i * tm
    h = jnp.where(rows < n_true, h, 0.0)
    csum_ref[...] += jnp.sum(h, axis=0, keepdims=True)

    @pl.when(i == pl.num_programs(1) - 1)
    def _finalize():
        c_ref[0] = jax.nn.sigmoid(csum_ref[...] * (1.0 / n_true))


def gcn_readout(adj_stack, fts_stack, b_gcn, alpha, adj_ids, fts_ids, *, tm, n_true):
    _, Np, _ = adj_stack.shape
    Hp = fts_stack.shape[2]
    a0, a1 = adj_ids
    f0, f1 = fts_ids
    adj_map = ((lambda g, i: (a0, i, 0)) if a0 == a1
               else (lambda g, i: (a0 + (a1 - a0) * g, i, 0)))
    fts_map = ((lambda g, i: (f0, 0, 0)) if f0 == f1
               else (lambda g, i: (f0 + (f1 - f0) * g, 0, 0)))
    kernel = functools.partial(_gcn_readout_kernel, n_true=n_true, tm=tm)
    return pl.pallas_call(
        kernel,
        grid=(2, Np // tm),
        in_specs=[
            pl.BlockSpec((1, tm, Np), adj_map),                 # adj row tiles (bf16)
            pl.BlockSpec((1, Np, Hp), fts_map),                 # resident fts slab
            pl.BlockSpec((1, Hp), lambda g, i: (0, 0)),         # resident bias (f32)
            pl.BlockSpec(memory_space=pltpu.MemorySpace.SMEM),  # PReLU alpha
        ],
        out_specs=pl.BlockSpec((1, 1, Hp), lambda g, i: (g, 0, 0)),
        out_shape=jax.ShapeDtypeStruct((2, 1, Hp), jnp.float32),
        scratch_shapes=[pltpu.VMEM((1, Hp), jnp.float32)],
        compiler_params=pltpu.CompilerParams(
            # row axis accumulates into csum scratch -> "arbitrary"
            dimension_semantics=("parallel", "arbitrary"),
            vmem_limit_bytes=32 * 1024 * 1024),
    )(adj_stack, fts_stack, b_gcn, alpha)


# ----------------------------------------------------------------------------
# 3) Fused GCN + folded discriminator for h_0 / h_2:
#      scores[g, n] = PReLU(adj @ fts + b)[n, :] @ u + 2 * b_bil
#    (u = W_bil @ (c_1 + c_3)^T, computed in the wrapper).  h never hits HBM.
# ----------------------------------------------------------------------------
def _gcn_disc_kernel(adj_ref, fts_ref, b_ref, u_ref, alpha_ref, bbil_ref, out_ref):
    z = jnp.dot(adj_ref[0], fts_ref[0], preferred_element_type=jnp.float32)
    z = z + b_ref[...]
    alpha = alpha_ref[0, 0]
    h = jnp.where(z > 0.0, z, alpha * z)                        # PReLU (f32)
    sc = jnp.dot(h, u_ref[...], preferred_element_type=jnp.float32)
    out_ref[0] = sc + 2.0 * bbil_ref[0, 0]


def gcn_hidden_disc(adj_stack, fts_stack, b_gcn, u_col, alpha, b_bil,
                    adj_ids, fts_ids, *, tm):
    _, Np, _ = adj_stack.shape
    Hp = fts_stack.shape[2]
    a0, a1 = adj_ids
    f0, f1 = fts_ids
    adj_map = ((lambda g, i: (a0, i, 0)) if a0 == a1
               else (lambda g, i: (a0 + (a1 - a0) * g, i, 0)))
    fts_map = ((lambda g, i: (f0, 0, 0)) if f0 == f1
               else (lambda g, i: (f0 + (f1 - f0) * g, 0, 0)))
    return pl.pallas_call(
        _gcn_disc_kernel,
        grid=(2, Np // tm),
        in_specs=[
            pl.BlockSpec((1, tm, Np), adj_map),                 # adj row tiles (bf16)
            pl.BlockSpec((1, Np, Hp), fts_map),                 # resident fts slab
            pl.BlockSpec((1, Hp), lambda g, i: (0, 0)),         # resident bias (f32)
            pl.BlockSpec((Hp, 1), lambda g, i: (0, 0)),         # resident u (f32)
            pl.BlockSpec(memory_space=pltpu.MemorySpace.SMEM),  # PReLU alpha
            pl.BlockSpec(memory_space=pltpu.MemorySpace.SMEM),  # bilinear bias
        ],
        out_specs=pl.BlockSpec((1, tm, 1), lambda g, i: (g, i, 0)),
        out_shape=jax.ShapeDtypeStruct((2, Np, 1), jnp.float32),
        compiler_params=pltpu.CompilerParams(
            dimension_semantics=("parallel", "parallel"),
            vmem_limit_bytes=32 * 1024 * 1024),
    )(adj_stack, fts_stack, b_gcn, u_col, alpha, b_bil)


# ----------------------------------------------------------------------------
# DGI forward
# ----------------------------------------------------------------------------
def dgi_forward(params, seq1, seq2, seq3, seq4, adj, aug_adj1, aug_adj2,
                sparse=False, msk=None, samp_bias1=None, samp_bias2=None,
                aug_type="edge"):
    # TODO(synk): sparse (torch.spmm), msk-weighted readout and samp_bias paths
    #             are not implemented (they are None/False in the standard
    #             DGI/GraphCL Cora/Citeseer setup).
    assert not sparse, "dense adjacency path only"
    assert msk is None and samp_bias1 is None and samp_bias2 is None

    w_gcn, b_gcn, alpha = params["w_gcn"], params["b_gcn"], params["alpha"]
    w_bil, b_bil = params["w_bil"], params["b_bil"]

    # squeeze batch (B = 1, as in DGI on Cora/Citeseer)
    s1, s2, s3, s4 = seq1[0], seq2[0], seq3[0], seq4[0]
    a, aa1, aa2 = adj[0], aug_adj1[0], aug_adj2[0]

    # unique seqs / adjs per augmentation type + per-graph (static) gather indices
    if aug_type == "edge":
        seqs, adjs = [s1, s2], [a, aa1, aa2]
        h_adj, h_fts = (0, 0), (0, 1)        # h_0 = (adj, s1),  h_2 = (adj, s2)
        r_adj, r_fts = (1, 2), (0, 0)        # h_1 = (aa1, s1),  h_3 = (aa2, s1)
    elif aug_type == "mask":
        seqs, adjs = [s1, s2, s3, s4], [a]
        h_adj, h_fts = (0, 0), (0, 1)
        r_adj, r_fts = (0, 0), (2, 3)        # h_1 = (adj, s3),  h_3 = (adj, s4)
    elif aug_type in ("node", "subgraph"):
        seqs, adjs = [s1, s2, s3, s4], [a, aa1, aa2]
        h_adj, h_fts = (0, 0), (0, 1)
        r_adj, r_fts = (1, 2), (2, 3)        # h_1 = (aa1, s3),  h_3 = (aa2, s4)
    else:
        raise AssertionError(f"unknown aug_type {aug_type}")

    N, F = s1.shape
    H = w_gcn.shape[1]
    Np, Fp, Hp = _round_up(N, 128), _round_up(F, 128), _round_up(H, 128)

    # zero-pad to (8,128)-friendly shapes; MXU operands in bf16, params in f32
    seq_stack = jnp.stack([_pad2(s, Np, Fp) for s in seqs]).astype(jnp.bfloat16)
    adj_stack = jnp.stack([_pad2(x, Np, Np) for x in adjs]).astype(jnp.bfloat16)
    w_gcn_p = _pad2(w_gcn, Fp, Hp).astype(jnp.bfloat16)
    b_gcn_p = _pad2(b_gcn, 1, Hp)                                  # f32
    w_bil_p = _pad2(w_bil, Hp, Hp)                                 # f32 (wrapper only)

    tm = _pick_tile(Np, 512)

    # 1) seq @ W once per unique seq (bf16 output, resident weight)
    fts = compute_fts(seq_stack, w_gcn_p, tm=tm)                   # (S, Np, Hp)

    # 2) c_1, c_3 (padded-row-masked readout); h_1 / h_3 never hit HBM
    c_pair = gcn_readout(adj_stack, fts, b_gcn_p, alpha, r_adj, r_fts,
                         tm=tm, n_true=N)                          # (2, 1, Hp)

    # 3) folded discriminator direction: u = W_bil @ (c1 + c3)^T   (tiny matvec)
    u_col = jnp.dot(w_bil_p, (c_pair[0, 0] + c_pair[1, 0]).reshape(Hp, 1))

    # 4) fused GCN(h_0, h_2) + discriminator epilogue; h_0 / h_2 never hit HBM
    scores = gcn_hidden_disc(adj_stack, fts, b_gcn_p, u_col, alpha, b_bil,
                             h_adj, h_fts, tm=tm)                  # (2, Np, 1)

    # ret1 + ret2 = [scores(h_0), scores(h_2)] laid out as (1, 2N)
    return scores[:, :N, 0].reshape(1, 2 * N)


def init_params(key, n_in, n_h):
    k1, k2, k3 = jax.random.split(key, 3)
    return {
        # nn.Linear(n_in, n_h, bias=False).weight, stored transposed as (n_in, n_h)
        "w_gcn": (jax.random.normal(k1, (n_in, n_h), jnp.float32)
                  / jnp.sqrt(jnp.float32(n_in))),
        # GCN bias (nonzero here so padded-row masking is actually exercised)
        "b_gcn": 0.1 * jax.random.normal(k3, (1, n_h), jnp.float32),
        "alpha": jnp.full((1, 1), 0.25, jnp.float32),     # PReLU (PyTorch default)
        # nn.Bilinear(n_h, n_h, 1).weight[0]
        "w_bil": (jax.random.normal(k2, (n_h, n_h), jnp.float32)
                  / jnp.sqrt(jnp.float32(n_h))),
        "b_bil": jnp.full((1, 1), 0.05, jnp.float32),     # nn.Bilinear bias
    }


# ----------------------------- pure-JAX reference -----------------------------
def _reference_forward(params, seq1, seq2, seq3, seq4, adj, aug_adj1, aug_adj2,
                       aug_type):
    w, b, alpha = params["w_gcn"], params["b_gcn"], params["alpha"][0, 0]
    wb, bb = params["w_bil"], params["b_bil"][0, 0]
    s1, s2, s3, s4 = seq1[0], seq2[0], seq3[0], seq4[0]
    a, aa1, aa2 = adj[0], aug_adj1[0], aug_adj2[0]

    def gcn(s, ad):
        z = ad @ (s @ w) + b
        return jnp.where(z > 0, z, alpha * z)

    h0 = gcn(s1, a)
    if aug_type == "edge":
        h1, h3 = gcn(s1, aa1), gcn(s1, aa2)
    elif aug_type == "mask":
        h1, h3 = gcn(s3, a), gcn(s4, a)
    else:
        h1, h3 = gcn(s3, aa1), gcn(s4, aa2)
    h2 = gcn(s2, a)
    c1 = jax.nn.sigmoid(jnp.mean(h1, axis=0, keepdims=True))
    c3 = jax.nn.sigmoid(jnp.mean(h3, axis=0, keepdims=True))

    def disc(c, h):
        return (h @ wb @ c.T).T + bb            # (1, N)

    ret1 = jnp.concatenate([disc(c1, h0), disc(c1, h2)], axis=1)
    ret2 = jnp.concatenate([disc(c3, h0), disc(c3, h2)], axis=1)
    return ret1 + ret2


if __name__ == "__main__":
    # Small, deliberately non-128-aligned shapes to exercise the padding/masking.
    B, N, F_IN, H = 1, 600, 100, 96
    key = jax.random.PRNGKey(0)
    kp, k1, k2, k3, k4, ka, ka1, ka2 = jax.random.split(key, 8)

    params = init_params(kp, F_IN, H)

    seq1 = jax.random.normal(k1, (B, N, F_IN), jnp.float32)
    seq2 = jax.random.normal(k2, (B, N, F_IN), jnp.float32)
    seq3 = jax.random.normal(k3, (B, N, F_IN), jnp.float32)
    seq4 = jax.random.normal(k4, (B, N, F_IN), jnp.float32)

    def rand_adj(k):
        m = jax.random.uniform(k, (B, N, N), jnp.float32)
        m = m + jnp.eye(N, dtype=jnp.float32)[None]
        return m / jnp.sum(m, axis=-1, keepdims=True)    # row-normalized dense adj

    adj = rand_adj(ka)
    aug_adj1 = rand_adj(ka1)
    aug_adj2 = rand_adj(ka2)

    fwd = jax.jit(functools.partial(dgi_forward, aug_type="edge"))
    ret = fwd(params, seq1, seq2, seq3, seq4, adj, aug_adj1, aug_adj2)
    jax.block_until_ready(ret)
    assert ret.shape == (B, 2 * N), ret.shape

    ref = _reference_forward(params, seq1, seq2, seq3, seq4, adj, aug_adj1,
                             aug_adj2, "edge")
    # bf16 MXU operands (f32 accumulation/epilogue) -> loosened relative check
    denom = float(jnp.maximum(jnp.max(jnp.abs(ref)), 1e-3))
    rel_err = float(jnp.max(jnp.abs(ret - ref)) / denom)
    assert rel_err < 5e-2, f"relative err {rel_err}"

    print("KERNEL_OK")
</pallas_src>

<mosaic_0001>
module attributes {stable_mosaic.version = 11 : i64} {
  func.func @_fts_kernel(%arg0: i32, %arg1: i32, %arg2: memref<1x128x128xbf16, #tpu.memory_space<vmem>>, %arg3: memref<128x128xbf16, #tpu.memory_space<vmem>>, %arg4: memref<1x128x128xbf16, #tpu.memory_space<vmem>>) attributes {dimension_semantics = [#tpu.dimension_semantics<parallel>, #tpu.dimension_semantics<parallel>], iteration_bounds = array<i64: 2, 5>, scalar_prefetch = 0 : i64, scratch_operands = 0 : i64, tpu.core_type = #tpu.core_type<tc>, window_params = [{transform_indices = @transform_0, window_bounds = array<i64: 1, 128, 128>}, {pipeline_mode = #tpu.pipeline_mode<synchronous>, transform_indices = @transform_1, window_bounds = array<i64: 128, 128>}, {transform_indices = @transform_2, window_bounds = array<i64: 1, 128, 128>}]} {
    %c0 = arith.constant 0 : index
    %c0_0 = arith.constant 0 : index
    %c0_1 = arith.constant 0 : index
    %0 = vector.load %arg2[%c0, %c0_0, %c0_1] : memref<1x128x128xbf16, #tpu.memory_space<vmem>>, vector<1x128x128xbf16>
    %1 = vector.shape_cast %0 : vector<1x128x128xbf16> to vector<128x128xbf16>
    %c0_2 = arith.constant 0 : index
    %c0_3 = arith.constant 0 : index
    %2 = vector.load %arg3[%c0_2, %c0_3] : memref<128x128xbf16, #tpu.memory_space<vmem>>, vector<128x128xbf16>
    %cst = arith.constant dense<0.000000e+00> : vector<128x128xf32>
    %3 = tpu.matmul %1, %2, %cst {dimension_numbers = #tpu.dot_dimension_numbers<[1], [0], [0], [1], [0, 0, 1, 1], [], []>} : vector<128x128xbf16>, vector<128x128xbf16>, vector<128x128xf32> -> vector<128x128xf32>
    %4 = arith.truncf %3 : vector<128x128xf32> to vector<128x128xbf16>
    %c0_4 = arith.constant 0 : index
    %c0_5 = arith.constant 0 : index
    %c0_6 = arith.constant 0 : index
    %5 = vector.load %arg4[%c0_4, %c0_5, %c0_6] : memref<1x128x128xbf16, #tpu.memory_space<vmem>>, vector<1x128x128xbf16>
    %6 = vector.shape_cast %5 : vector<1x128x128xbf16> to vector<128x128xbf16>
    %7 = vector.shape_cast %4 : vector<128x128xbf16> to vector<1x128x128xbf16>
    tpu.vector_store %arg4[%c0_4, %c0_5, %c0_6], %7 {strides = array<i32>} : memref<1x128x128xbf16, #tpu.memory_space<vmem>>, vector<1x128x128xbf16>,
    return
  }
  func.func @transform_0(%arg0: i32, %arg1: i32) -> (i32, i32, i32) {
    %c0_i32 = arith.constant 0 : i32
    %c0_i32_0 = arith.constant 0 : i32
    return %arg0, %arg1, %c0_i32 : i32, i32, i32
  }
  func.func @transform_1(%arg0: i32, %arg1: i32) -> (i32, i32) {
    %c0_i32 = arith.constant 0 : i32
    %c0_i32_0 = arith.constant 0 : i32
    %c0_i32_1 = arith.constant 0 : i32
    return %c0_i32, %c0_i32_0 : i32, i32
  }
  func.func @transform_2(%arg0: i32, %arg1: i32) -> (i32, i32, i32) {
    %c0_i32 = arith.constant 0 : i32
    %c0_i32_0 = arith.constant 0 : i32
    return %arg0, %arg1, %c0_i32 : i32, i32, i32
  }
}

module attributes {stable_mosaic.version = 11 : i64} {
  func.func @_gcn_readout_kernel(%arg0: i32, %arg1: i32, %arg2: memref<1x128x640xbf16, #tpu.memory_space<vmem>>, %arg3: memref<1x640x128xbf16, #tpu.memory_space<vmem>>, %arg4: memref<1x128xf32, #tpu.memory_space<vmem>>, %arg5: memref<1x1xf32, #tpu.memory_space<smem>>, %arg6: memref<1x1x128xf32, #tpu.memory_space<vmem>>, %arg7: memref<1x128xf32, #tpu.memory_space<vmem>>) attributes {dimension_semantics = [#tpu.dimension_semantics<parallel>, #tpu.dimension_semantics<arbitrary>], iteration_bounds = array<i64: 2, 5>, scalar_prefetch = 0 : i64, scratch_operands = 1 : i64, tpu.core_type = #tpu.core_type<tc>, window_params = [{transform_indices = @transform_0, window_bounds = array<i64: 1, 128, 640>}, {transform_indices = @transform_1, window_bounds = array<i64: 1, 640, 128>}, {pipeline_mode = #tpu.pipeline_mode<synchronous>, transform_indices = @transform_2, window_bounds = array<i64: 1, 128>}, {transform_indices = @transform_3, window_bounds = array<i64: 1, 1>}, {transform_indices = @transform_4, window_bounds = array<i64: 1, 1, 128>}]} {
    %c0_i32 = arith.constant 0 : i32
    %0 = arith.cmpi eq, %arg1, %c0_i32 : i32
    %1 = arith.extui %0 : i1 to i32
    %c0_i32_0 = arith.constant 0 : i32
    %2 = arith.cmpi ne, %1, %c0_i32_0 : i32
    scf.if %2 {
      %cst_18 = arith.constant 0.000000e+00 : f32
      %35 = vector.broadcast %cst_18 : f32 to vector<1x128xf32>
      %c0_19 = arith.constant 0 : index
      %c0_20 = arith.constant 0 : index
      %36 = vector.load %arg7[%c0_19, %c0_20] : memref<1x128xf32, #tpu.memory_space<vmem>>, vector<1x128xf32>
      tpu.vector_store %arg7[%c0_19, %c0_20], %35 {strides = array<i32>} : memref<1x128xf32, #tpu.memory_space<vmem>>, vector<1x128xf32>,
    } else {
    }
    %c0 = arith.constant 0 : index
    %c0_1 = arith.constant 0 : index
    %c0_2 = arith.constant 0 : index
    %3 = vector.load %arg2[%c0, %c0_1, %c0_2] : memref<1x128x640xbf16, #tpu.memory_space<vmem>>, vector<1x128x640xbf16>
    %4 = vector.shape_cast %3 : vector<1x128x640xbf16> to vector<128x640xbf16>
    %c0_3 = arith.constant 0 : index
    %c0_4 = arith.constant 0 : index
    %c0_5 = arith.constant 0 : index
    %5 = vector.load %arg3[%c0_3, %c0_4, %c0_5] : memref<1x640x128xbf16, #tpu.memory_space<vmem>>, vector<1x640x128xbf16>
    %6 = vector.shape_cast %5 : vector<1x640x128xbf16> to vector<640x128xbf16>
    %cst = arith.constant dense<0.000000e+00> : vector<128x128xf32>
    %7 = tpu.matmul %4, %6, %cst {dimension_numbers = #tpu.dot_dimension_numbers<[1], [0], [0], [1], [0, 0, 1, 1], [], []>} : vector<128x640xbf16>, vector<640x128xbf16>, vector<128x128xf32> -> vector<128x128xf32>
    %c0_6 = arith.constant 0 : index
    %c0_7 = arith.constant 0 : index
    %8 = vector.load %arg4[%c0_6, %c0_7] : memref<1x128xf32, #tpu.memory_space<vmem>>, vector<1x128xf32>
    %9 = vector.broadcast %8 : vector<1x128xf32> to vector<128x128xf32>
    %10 = arith.addf %7, %9 : vector<128x128xf32>
    %c0_8 = arith.constant 0 : index
    %c0_9 = arith.constant 0 : index
    %11 = memref.load %arg5[%c0_8, %c0_9] : memref<1x1xf32, #tpu.memory_space<smem>>
    %cst_10 = arith.constant 0.000000e+00 : f32
    %12 = vector.broadcast %cst_10 : f32 to vector<128x128xf32>
    %13 = arith.cmpf ogt, %10, %12 : vector<128x128xf32>
    %14 = vector.broadcast %11 : f32 to vector<128x128xf32>
    %15 = arith.mulf %14, %10 : vector<128x128xf32>
    %16 = arith.select %13, %10, %15 : vector<128x128xi1>, vector<128x128xf32>
    %17 = tpu.iota {dimensions = array<i32: 0>} : vector<128x1xi32>
    %c128_i32 = arith.constant 128 : i32
    %18 = arith.muli %arg1, %c128_i32 : i32
    %19 = vector.broadcast %18 : i32 to vector<128x1xi32>
    %20 = arith.addi %17, %19 : vector<128x1xi32>
    %c600_i32 = arith.constant 600 : i32
    %21 = vector.broadcast %c600_i32 : i32 to vector<128x1xi32>
    %22 = arith.cmpi slt, %20, %21 : vector<128x1xi32>
    %cst_11 = arith.constant 0.000000e+00 : f32
    %23 = vector.shape_cast %22 : vector<128x1xi1> to vector<128x1xi1>
    %24 = vector.broadcast %23 : vector<128x1xi1> to vector<128x128xi1>
    %25 = vector.broadcast %cst_11 : f32 to vector<128x128xf32>
    %26 = arith.select %24, %16, %25 : vector<128x128xi1>, vector<128x128xf32>
    %c0_12 = arith.constant 0 : index
    %c0_13 = arith.constant 0 : index
    %27 = vector.load %arg7[%c0_12, %c0_13] : memref<1x128xf32, #tpu.memory_space<vmem>>, vector<1x128xf32>
    %cst_14 = arith.constant dense<0.000000e+00> : vector<128xf32>
    %28 = vector.multi_reduction <add>, %26, %cst_14 [0] : vector<128x128xf32> to vector<128xf32>
    %29 = vector.shape_cast %28 : vector<128xf32> to vector<1x128xf32>
    %30 = arith.addf %27, %29 : vector<1x128xf32>
    %c0_15 = arith.constant 0 : index
    %c0_16 = arith.constant 0 : index
    %31 = vector.load %arg7[%c0_15, %c0_16] : memref<1x128xf32, #tpu.memory_space<vmem>>, vector<1x128xf32>
    tpu.vector_store %arg7[%c0_15, %c0_16], %30 {strides = array<i32>} : memref<1x128xf32, #tpu.memory_space<vmem>>, vector<1x128xf32>,
    %c4_i32 = arith.constant 4 : i32
    %32 = arith.cmpi eq, %arg1, %c4_i32 : i32
    %33 = arith.extui %32 : i1 to i32
    %c0_i32_17 = arith.constant 0 : i32
    %34 = arith.cmpi ne, %33, %c0_i32_17 : i32
    scf.if %34 {
      %c0_18 = arith.constant 0 : index
      %c0_19 = arith.constant 0 : index
      %35 = vector.load %arg7[%c0_18, %c0_19] : memref<1x128xf32, #tpu.memory_space<vmem>>, vector<1x128xf32>
      %cst_20 = arith.constant 0.00166666671 : f32
      %36 = vector.broadcast %cst_20 : f32 to vector<1x128xf32>
      %37 = arith.mulf %35, %36 : vector<1x128xf32>
      %38 = arith.negf %37 : vector<1x128xf32>
      %39 = math.exp %38 : vector<1x128xf32>
      %cst_21 = arith.constant 1.000000e+00 : f32
      %40 = vector.broadcast %cst_21 : f32 to vector<1x128xf32>
      %41 = arith.addf %40, %39 : vector<1x128xf32>
      %42 = arith.divf %40, %41 : vector<1x128xf32>
      %c0_22 = arith.constant 0 : index
      %c0_23 = arith.constant 0 : index
      %c0_24 = arith.constant 0 : index
      %43 = vector.load %arg6[%c0_22, %c0_23, %c0_24] : memref<1x1x128xf32, #tpu.memory_space<vmem>>, vector<1x1x128xf32>
      %44 = vector.shape_cast %43 : vector<1x1x128xf32> to vector<1x128xf32>
      %45 = vector.shape_cast %42 : vector<1x128xf32> to vector<1x1x128xf32>
      tpu.vector_store %arg6[%c0_22, %c0_23, %c0_24], %45 {strides = array<i32>} : memref<1x1x128xf32, #tpu.memory_space<vmem>>, vector<1x1x128xf32>,
    } else {
    }
    return
  }
  func.func @transform_0(%arg0: i32, %arg1: i32) -> (i32, i32, i32) {
    %c1_i32 = arith.constant 1 : i32
    %0 = arith.muli %c1_i32, %arg0 : i32
    %c1_i32_0 = arith.constant 1 : i32
    %1 = arith.addi %c1_i32_0, %0 : i32
    %c0_i32 = arith.constant 0 : i32
    %c0_i32_1 = arith.constant 0 : i32
    return %1, %arg1, %c0_i32 : i32, i32, i32
  }
  func.func @transform_1(%arg0: i32, %arg1: i32) -> (i32, i32, i32) {
    %c0_i32 = arith.constant 0 : i32
    %c0_i32_0 = arith.constant 0 : i32
    %c0_i32_1 = arith.constant 0 : i32
    %c0_i32_2 = arith.constant 0 : i32
    return %c0_i32, %c0_i32_0, %c0_i32_1 : i32, i32, i32
  }
  func.func @transform_2(%arg0: i32, %arg1: i32) -> (i32, i32) {
    %c0_i32 = arith.constant 0 : i32
    %c0_i32_0 = arith.constant 0 : i32
    %c0_i32_1 = arith.constant 0 : i32
    return %c0_i32, %c0_i32_0 : i32, i32
  }
  func.func @transform_3(%arg0: i32, %arg1: i32) -> (i32, i32) {
    %c0_i32 = arith.constant 0 : i32
    %c0_i32_0 = arith.constant 0 : i32
    %c0_i32_1 = arith.constant 0 : i32
    return %c0_i32, %c0_i32_0 : i32, i32
  }
  func.func @transform_4(%arg0: i32, %arg1: i32) -> (i32, i32, i32) {
    %c0_i32 = arith.constant 0 : i32
    %c0_i32_0 = arith.constant 0 : i32
    %c0_i32_1 = arith.constant 0 : i32
    return %arg0, %c0_i32, %c0_i32_0 : i32, i32, i32
  }
}

module attributes {stable_mosaic.version = 11 : i64} {
  func.func @_gcn_disc_kernel(%arg0: i32, %arg1: i32, %arg2: memref<1x128x640xbf16, #tpu.memory_space<vmem>>, %arg3: memref<1x640x128xbf16, #tpu.memory_space<vmem>>, %arg4: memref<1x128xf32, #tpu.memory_space<vmem>>, %arg5: memref<128x1xf32, #tpu.memory_space<vmem>>, %arg6: memref<1x1xf32, #tpu.memory_space<smem>>, %arg7: memref<1x1xf32, #tpu.memory_space<smem>>, %arg8: memref<1x128x1xf32, #tpu.memory_space<vmem>>) attributes {dimension_semantics = [#tpu.dimension_semantics<parallel>, #tpu.dimension_semantics<parallel>], iteration_bounds = array<i64: 2, 5>, scalar_prefetch = 0 : i64, scratch_operands = 0 : i64, tpu.core_type = #tpu.core_type<tc>, window_params = [{transform_indices = @transform_0, window_bounds = array<i64: 1, 128, 640>}, {transform_indices = @transform_1, window_bounds = array<i64: 1, 640, 128>}, {pipeline_mode = #tpu.pipeline_mode<synchronous>, transform_indices = @transform_2, window_bounds = array<i64: 1, 128>}, {pipeline_mode = #tpu.pipeline_mode<synchronous>, transform_indices = @transform_3, window_bounds = array<i64: 128, 1>}, {transform_indices = @transform_4, window_bounds = array<i64: 1, 1>}, {transform_indices = @transform_5, window_bounds = array<i64: 1, 1>}, {transform_indices = @transform_6, window_bounds = array<i64: 1, 128, 1>}]} {
    %c0 = arith.constant 0 : index
    %c0_0 = arith.constant 0 : index
    %c0_1 = arith.constant 0 : index
    %0 = vector.load %arg2[%c0, %c0_0, %c0_1] : memref<1x128x640xbf16, #tpu.memory_space<vmem>>, vector<1x128x640xbf16>
    %1 = vector.shape_cast %0 : vector<1x128x640xbf16> to vector<128x640xbf16>
    %c0_2 = arith.constant 0 : index
    %c0_3 = arith.constant 0 : index
    %c0_4 = arith.constant 0 : index
    %2 = vector.load %arg3[%c0_2, %c0_3, %c0_4] : memref<1x640x128xbf16, #tpu.memory_space<vmem>>, vector<1x640x128xbf16>
    %3 = vector.shape_cast %2 : vector<1x640x128xbf16> to vector<640x128xbf16>
    %cst = arith.constant dense<0.000000e+00> : vector<128x128xf32>
    %4 = tpu.matmul %1, %3, %cst {dimension_numbers = #tpu.dot_dimension_numbers<[1], [0], [0], [1], [0, 0, 1, 1], [], []>} : vector<128x640xbf16>, vector<640x128xbf16>, vector<128x128xf32> -> vector<128x128xf32>
    %c0_5 = arith.constant 0 : index
    %c0_6 = arith.constant 0 : index
    %5 = vector.load %arg4[%c0_5, %c0_6] : memref<1x128xf32, #tpu.memory_space<vmem>>, vector<1x128xf32>
    %6 = vector.broadcast %5 : vector<1x128xf32> to vector<128x128xf32>
    %7 = arith.addf %4, %6 : vector<128x128xf32>
    %c0_7 = arith.constant 0 : index
    %c0_8 = arith.constant 0 : index
    %8 = memref.load %arg6[%c0_7, %c0_8] : memref<1x1xf32, #tpu.memory_space<smem>>
    %cst_9 = arith.constant 0.000000e+00 : f32
    %9 = vector.broadcast %cst_9 : f32 to vector<128x128xf32>
    %10 = arith.cmpf ogt, %7, %9 : vector<128x128xf32>
    %11 = vector.broadcast %8 : f32 to vector<128x128xf32>
    %12 = arith.mulf %11, %7 : vector<128x128xf32>
    %13 = arith.select %10, %7, %12 : vector<128x128xi1>, vector<128x128xf32>
    %c0_10 = arith.constant 0 : index
    %c0_11 = arith.constant 0 : index
    %14 = vector.load %arg5[%c0_10, %c0_11] : memref<128x1xf32, #tpu.memory_space<vmem>>, vector<128x1xf32>
    %cst_12 = arith.constant dense<0.000000e+00> : vector<128x1xf32>
    %15 = tpu.matmul %13, %14, %cst_12 {dimension_numbers = #tpu.dot_dimension_numbers<[1], [0], [0], [1], [0, 0, 1, 1], [], []>} : vector<128x128xf32>, vector<128x1xf32>, vector<128x1xf32> -> vector<128x1xf32>
    %c0_13 = arith.constant 0 : index
    %c0_14 = arith.constant 0 : index
    %16 = memref.load %arg7[%c0_13, %c0_14] : memref<1x1xf32, #tpu.memory_space<smem>>
    %cst_15 = arith.constant 2.000000e+00 : f32
    %17 = arith.mulf %cst_15, %16 : f32
    %18 = vector.broadcast %17 : f32 to vector<128x1xf32>
    %19 = arith.addf %15, %18 : vector<128x1xf32>
    %c0_16 = arith.constant 0 : index
    %c0_17 = arith.constant 0 : index
    %c0_18 = arith.constant 0 : index
    %20 = vector.load %arg8[%c0_16, %c0_17, %c0_18] : memref<1x128x1xf32, #tpu.memory_space<vmem>>, vector<1x128x1xf32>
    %21 = vector.shape_cast %20 : vector<1x128x1xf32> to vector<128x1xf32>
    %22 = vector.shape_cast %19 : vector<128x1xf32> to vector<1x128x1xf32>
    tpu.vector_store %arg8[%c0_16, %c0_17, %c0_18], %22 {strides = array<i32>} : memref<1x128x1xf32, #tpu.memory_space<vmem>>, vector<1x128x1xf32>,
    return
  }
  func.func @transform_0(%arg0: i32, %arg1: i32) -> (i32, i32, i32) {
    %c0_i32 = arith.constant 0 : i32
    %c0_i32_0 = arith.constant 0 : i32
    %c0_i32_1 = arith.constant 0 : i32
    return %c0_i32, %arg1, %c0_i32_0 : i32, i32, i32
  }
  func.func @transform_1(%arg0: i32, %arg1: i32) -> (i32, i32, i32) {
    %c1_i32 = arith.constant 1 : i32
    %0 = arith.muli %c1_i32, %arg0 : i32
    %c0_i32 = arith.constant 0 : i32
    %1 = arith.addi %c0_i32, %0 : i32
    %c0_i32_0 = arith.constant 0 : i32
    %c0_i32_1 = arith.constant 0 : i32
    %c0_i32_2 = arith.constant 0 : i32
    return %1, %c0_i32_0, %c0_i32_1 : i32, i32, i32
  }
  func.func @transform_2(%arg0: i32, %arg1: i32) -> (i32, i32) {
    %c0_i32 = arith.constant 0 : i32
    %c0_i32_0 = arith.constant 0 : i32
    %c0_i32_1 = arith.constant 0 : i32
    return %c0_i32, %c0_i32_0 : i32, i32
  }
  func.func @transform_3(%arg0: i32, %arg1: i32) -> (i32, i32) {
    %c0_i32 = arith.constant 0 : i32
    %c0_i32_0 = arith.constant 0 : i32
    %c0_i32_1 = arith.constant 0 : i32
    return %c0_i32, %c0_i32_0 : i32, i32
  }
  func.func @transform_4(%arg0: i32, %arg1: i32) -> (i32, i32) {
    %c0_i32 = arith.constant 0 : i32
    %c0_i32_0 = arith.constant 0 : i32
    %c0_i32_1 = arith.constant 0 : i32
    return %c0_i32, %c0_i32_0 : i32, i32
  }
  func.func @transform_5(%arg0: i32, %arg1: i32) -> (i32, i32) {
    %c0_i32 = arith.constant 0 : i32
    %c0_i32_0 = arith.constant 0 : i32
    %c0_i32_1 = arith.constant 0 : i32
    return %c0_i32, %c0_i32_0 : i32, i32
  }
  func.func @transform_6(%arg0: i32, %arg1: i32) -> (i32, i32, i32) {
    %c0_i32 = arith.constant 0 : i32
    %c0_i32_0 = arith.constant 0 : i32
    return %arg0, %arg1, %c0_i32 : i32, i32, i32
  }
}

</mosaic_0001>

<bundles_post_ra>
// kernel: dgi_forward.3
= control target key start
LH: loop header
LB: loop body
LE: loop exit
PB: predicated region body
PF: predicated region fallthrough
CT: control target
= control target key end

     0   :  { %s740_s9 = smov 0   ;;  %s742_s10 = smov 0   ;;  %s829_s0 = inlined_call_operand.vmem [shape: bf16[2,640,128], index: 0, kind: input, shape index: {}]   ;;  %s830_s1 = inlined_call_operand.vmem [shape: bf16[128,128], index: 1, kind: input, shape index: {}]   ;;  %s831_s2 = inlined_call_operand.vmem [shape: bf16[2,640,128], index: 2, kind: output, shape index: {}]  }
   0x1   :  { %s744_s11 = smov 0   ;;  %s746_s12 = smov 0  }
   0x2   :  { %s748_s13 = smov 0  }
   0x3 LB: > { %s21_s14 = sadd.s32 1, %s715_s11  ;;  %s24_s15 = sadd.s32 1, %s719_s12  ;;  %s723_s13 = sphi %s748_s13, %s12_s13   ;;  %s719_s12 = sphi %s746_s12, %s835_s12   ;;  %s715_s11 = sphi %s744_s11, %s834_s11   ;;  %s711_s10 = sphi %s742_s10, %s833_s10   ;;  %s707_s9 = sphi %s740_s9, %s832_s9  }
   0x4   : > { %p22_p0 = scmp.ge.s32.totalorder %s21_s14, 5  ;;  %p486_p1 = scmp.ge.s32.totalorder %s723_s13, 1 }
   0x5   : > { %p133_p2 = scmp.lt.s32.totalorder %s723_s13, 11 }
   0x6   : > { %s837_s14 = smov (%p22_p0, %s21_s14), 0  ;;  %s839_s15 = smov (!%p22_p0, %s24_s15), %s719_s12 }
   0x7   : > { %p134_p3 = pnand %p486_p1, %p133_p2  ;;  %p26_p4 = scmp.ge.s32.totalorder %s839_s15, 2 }
   0x8   : > { %s487_s22 = sshll.u32 (!%p134_p3), %s707_s9, 4  ;;  %p164_p5 = scmp.lt.s32.totalorder (!%p134_p3), %s711_s10, 1 }
   0x9   : > { %s841_s15 = smov (%p26_p4, %s839_s15), 0  ;;  %137 = sbr.rel (%p134_p3) target bundleno = 207 (0xcf), region = 28 }
   0xa   : > { %p166_p6 = scmp.lt.s32.totalorder (!%p134_p3), %s487_s22, 79 }
   0xe   : > { %v572_v0 = vld [vmem:[%s830_s1 + $0x38] sm:$0xff]  ;;  %v571_v1 = vld [vmem:[%s830_s1 + $0x30] sm:$0xff]  ;;  %v570_v2 = vld [vmem:[%s830_s1 + $0x28] sm:$0xff]  ;;  %s843_s10 = smov (!%p164_p5, %s711_s10), 1  ;;  %s845_s22 = smov (!%p166_p6, %s487_s22), 79 }
   0xf   : > { %311 = vmatpush.bf16.msra.mxu0 %v572_v0  ;;  %620 = vmatpush.bf16.msra.mxu1 %v572_v0  ;;  %v569_v3 = vld [vmem:[%s830_s1 + $0x20] sm:$0xff]  ;;  %v568_v4 = vld [vmem:[%s830_s1 + $0x18] sm:$0xff]  ;;  %s644_s27 = smul.u32 80, %s843_s10  ;;  %v567_v5 = vld [vmem:[%s830_s1 + $0x10] sm:$0xff] }
  0x10   : > { %621 = vmatpush.bf16.msra.mxu2 %v572_v0  ;;  %622 = vmatpush.bf16.msra.mxu3 %v572_v0  ;;  %v566_v6 = vld [vmem:[%s830_s1 + $0x8] sm:$0xff]  ;;  %v565_v7 = vld [vmem:[%s830_s1] sm:$0xff] }
  0x11   : > { %s795_s30 = sadd.s32 %s644_s27, %s845_s22 }
  0x12   : > { %s488_s5 = sshll.u32 %s795_s30, 2 }
  0x13   : > { %312 = vmatpush.bf16.msra.mxu0 %v571_v1  ;;  %623 = vmatpush.bf16.msra.mxu1 %v571_v1  ;;  %s171_s10 = scalar_lea.vmem %s829_s0, %s488_s5  ;;  %s181_s18 = scalar_lea.vmem %s831_s2, %s488_s5 }
  0x14   : > { %624 = vmatpush.bf16.msra.mxu2 %v571_v1  ;;  %625 = vmatpush.bf16.msra.mxu3 %v571_v1  ;;  %v557_v8 = vld [vmem:[%s171_s10] sm:$0xff]  ;;  %v559_v9 = vld [vmem:[%s171_s10 + $0x10] sm:$0xff]  ;;  %v558_v12 = vld [vmem:[%s171_s10 + $0x8] sm:$0xff] }
  0x15   : > { %v561_v10 = vld [vmem:[%s171_s10 + $0x20] sm:$0xff]  ;;  %v563_v11 = vld [vmem:[%s171_s10 + $0x30] sm:$0xff]  ;;  %v560_v13 = vld [vmem:[%s171_s10 + $0x18] sm:$0xff] }
  0x16   : > { %v562_v14 = vld [vmem:[%s171_s10 + $0x28] sm:$0xff]  ;;  %v564_v15 = vld [vmem:[%s171_s10 + $0x38] sm:$0xff] }
  0x17   : > { %313 = vmatpush.bf16.msra.mxu0 %v570_v2  ;;  %626 = vmatpush.bf16.msra.mxu1 %v570_v2 }
  0x18   : > { %627 = vmatpush.bf16.msra.mxu2 %v570_v2  ;;  %628 = vmatpush.bf16.msra.mxu3 %v570_v2 }
  0x1b   : > { %314 = vmatpush.bf16.msra.mxu0 %v569_v3  ;;  %629 = vmatpush.bf16.msra.mxu1 %v569_v3 }
  0x1c   : > { %630 = vmatpush.bf16.msra.mxu2 %v569_v3  ;;  %631 = vmatpush.bf16.msra.mxu3 %v569_v3 }
  0x1f   : > { %315 = vmatpush.bf16.msra.mxu0 %v568_v4  ;;  %632 = vmatpush.bf16.msra.mxu1 %v568_v4 }
  0x20   : > { %633 = vmatpush.bf16.msra.mxu2 %v568_v4  ;;  %634 = vmatpush.bf16.msra.mxu3 %v568_v4 }
  0x23   : > { %316 = vmatpush.bf16.msra.mxu0 %v567_v5  ;;  %635 = vmatpush.bf16.msra.mxu1 %v567_v5 }
  0x24   : > { %636 = vmatpush.bf16.msra.mxu2 %v567_v5  ;;  %637 = vmatpush.bf16.msra.mxu3 %v567_v5 }
  0x27   : > { %317 = vmatpush.bf16.msra.mxu0 %v566_v6  ;;  %638 = vmatpush.bf16.msra.mxu1 %v566_v6 }
  0x28   : > { %639 = vmatpush.bf16.msra.mxu2 %v566_v6  ;;  %640 = vmatpush.bf16.msra.mxu3 %v566_v6 }
  0x2b   : > { %318 = vmatpush.bf16.msra.mxu0 %v565_v7  ;;  %641 = vmatpush.bf16.msra.mxu1 %v565_v7 }
  0x2c   : > { %642 = vmatpush.bf16.msra.mxu2 %v565_v7  ;;  %643 = vmatpush.bf16.msra.mxu3 %v565_v7 }
  0x2e   : > { %319 = vmatmul.bf16.vlgmr.msra.gmra.mxu0 %v557_v8  ;;  %329 = vmatmul.bf16.vlgmr.msra.gmra.mxu1 %v559_v9 }
  0x2f   : > { %339 = vmatmul.bf16.vlgmr.msra.gmra.mxu2 %v561_v10  ;;  %349 = vmatmul.bf16.vlgmr.msra.gmra.mxu3 %v563_v11 }
  0x3e   : > { %324 = vmatmul.bf16.gmra.mxu0 %v558_v12  ;;  %334 = vmatmul.bf16.gmra.mxu1 %v560_v13 }
  0x3f   : > { %344 = vmatmul.bf16.gmra.mxu2 %v562_v14  ;;  %354 = vmatmul.bf16.gmra.mxu3 %v564_v15 }
  0xab   : > { %v320_v16 = vpop.f32.mrf.mxu0  ;;  %v330_v17 = vpop.f32.mrf.mxu1 }
  0xb2   : > { %v340_v18 = vpop.f32.mrf.mxu2  ;;  %v350_v19 = vpop.f32.mrf.mxu3 }
  0xb3   : > { %v322_v20 = vpop.f32.mrf.mxu0  ;;  %v332_v21 = vpop.f32.mrf.mxu1 }
  0xb4   : > { %v576_v22 = vpack.c.bf16 %v322_v20, %v320_v16  ;;  %v586_v23 = vpack.c.bf16 %v332_v21, %v330_v17 }
  0xb6   : > { %577 = vst [vmem:[%s181_s18] sm:$0xff] %v576_v22  }
  0xb7   : > { %614 = vst [vmem:[%s181_s18 + $0x10] sm:$0xff] %v586_v23  }
  0xba   : > { %v342_v24 = vpop.f32.mrf.mxu2  ;;  %v352_v25 = vpop.f32.mrf.mxu3 }
  0xbb   : > { %v596_v26 = vpack.c.bf16 %v342_v24, %v340_v18  ;;  %v606_v27 = vpack.c.bf16 %v352_v25, %v350_v19  ;;  %v325_v28 = vpop.f32.mrf.mxu0  ;;  %v335_v29 = vpop.f32.mrf.mxu1 }
  0xbd   : > { %616 = vst [vmem:[%s181_s18 + $0x20] sm:$0xff] %v596_v26  }
  0xbe   : > { %618 = vst [vmem:[%s181_s18 + $0x30] sm:$0xff] %v606_v27  }
  0xc2   : > { %v345_v30 = vpop.f32.mrf.mxu2  ;;  %v355_v31 = vpop.f32.mrf.mxu3 }
  0xc3   : > { %v327_v32 = vpop.f32.mrf.mxu0  ;;  %v337_v33 = vpop.f32.mrf.mxu1 }
  0xc4   : > { %v581_v34 = vpack.c.bf16 %v327_v32, %v325_v28  ;;  %v591_v35 = vpack.c.bf16 %v337_v33, %v335_v29 }
  0xc6   : > { %613 = vst [vmem:[%s181_s18 + $0x8] sm:$0xff] %v581_v34  }
  0xc7   : > { %615 = vst [vmem:[%s181_s18 + $0x18] sm:$0xff] %v591_v35  }
  0xca   : > { %v347_v36 = vpop.f32.mrf.mxu2  ;;  %v357_v37 = vpop.f32.mrf.mxu3 }
  0xcb   : > { %v601_v38 = vpack.c.bf16 %v347_v36, %v345_v30  ;;  %v611_v39 = vpack.c.bf16 %v357_v37, %v355_v31 }
  0xcd   : > { %617 = vst [vmem:[%s181_s18 + $0x28] sm:$0xff] %v601_v38  }
  0xce   : > { %619 = vst [vmem:[%s181_s18 + $0x38] sm:$0xff] %v611_v39  }
  0xcf PF: > { %s12_s13 = sadd.s32 1, %s723_s13   ;;  %s832_s9 = smov %s715_s11 }
  0xd0   : > { %p9_p7 = scmp.ge.s32.totalorder %s12_s13, 12   ;;  %s833_s10 = smov %s719_s12 }
  0xd1   : > { %s834_s11 = smov %s837_s14  ;;  %s835_s12 = smov %s841_s15 }
  0xd2   :  { %11 = sbr.rel (!%p9_p7) target bundleno = 3 (0x3), region = 58 }

// kernel: dgi_forward.5
= control target key start
LH: loop header
LB: loop body
LE: loop exit
PB: predicated region body
PF: predicated region fallthrough
CT: control target
= control target key end

     0   :  { %s1927_s25 = smov 0   ;;  %s1929_s26 = smov 0   ;;  %s2285_s0 = inlined_call_operand.vmem [shape: bf16[3,640,640], index: 0, kind: input, shape index: {}]   ;;  %s2286_s1 = inlined_call_operand.vmem [shape: bf16[2,640,128], index: 1, kind: input, shape index: {}]   ;;  %s2287_s2 = inlined_call_operand.vmem [shape: f32[1,128], index: 2, kind: input, shape index: {}]   ;;  %s2288_s3 = inlined_call_operand.vmem [shape: f32[128,1], index: 3, kind: input, shape index: {}]   ;;  %s2289_s4 = inlined_call_operand.<no memory space> [shape: f32[1,1], index: 4, kind: input, shape index: {}]   ;;  %s2290_s5 = inlined_call_operand.<no memory space> [shape: f32[1,1], index: 5, kind: input, shape index: {}]   ;;  %s2291_s6 = inlined_call_operand.vmem [shape: f32[2,640,1], index: 6, kind: output, shape index: {}]  }
   0x1   :  { %11 = sst [smem:[#allocation2]] %s2289_s4  ;;  %s1931_s27 = smov 0  }
   0x2   :  { %12 = sst [smem:[#allocation3]] %s2290_s5  ;;  %s1933_s28 = smov 0  }
   0x3   :  { %s1935_s29 = smov 0  }
   0x4 LB: > { %s27_s4 = sadd.s32 1, %s1876_s27  ;;  %s30_s5 = sadd.s32 1, %s1880_s28  ;;  %s1884_s29 = sphi %s1935_s29, %s18_s29   ;;  %s1880_s28 = sphi %s1933_s28, %s2295_s28   ;;  %s1876_s27 = sphi %s1931_s27, %s2294_s27   ;;  %s1872_s26 = sphi %s1929_s26, %s2293_s26   ;;  %s1868_s25 = sphi %s1927_s25, %s2292_s25  }
   0x5   : > { %p28_p0 = scmp.ge.s32.totalorder %s27_s4, 5  ;;  %p1378_p1 = scmp.ge.s32.totalorder %s1884_s29, 1 }
   0x6   : > { %p240_p2 = scmp.lt.s32.totalorder %s1884_s29, 11 }
   0x7   : > { %s2297_s4 = smov (%p28_p0, %s27_s4), 0  ;;  %s2299_s5 = smov (!%p28_p0, %s30_s5), %s1880_s28 }
   0x8   : > { %p241_p3 = pnand %p1378_p1, %p240_p2  ;;  %p32_p4 = scmp.ge.s32.totalorder %s2299_s5, 2 }
   0x9   : > { %p287_p5 = scmp.lt.s32.totalorder (!%p241_p3), %s1872_s26, 1  ;;  %s1379_s10 = sshll.u32 (!%p241_p3), %s1868_s25, 4 }
   0xa   : > { %s2301_s5 = smov (%p32_p4, %s2299_s5), 0  ;;  %244 = sbr.rel (%p241_p3) target bundleno = 505 (0x1f9), region = 44 }
   0xb   : > { %p281_p6 = scmp.lt.s32.totalorder (!%p241_p3), %s1379_s10, 79  ;;  %s1193_s12 = sld [smem:[#allocation3]] (!%p241_p3) }
   0xf   : > { %s2303_s26 = smov (!%p287_p5, %s1872_s26), 1  ;;  %s2305_s10 = smov (!%p281_p6, %s1379_s10), 79 }
  0x10   : > { %s1803_s30 = smul.u32 320, %s2303_s26 }
  0x11   : > { %s1802_s11 = smul.u32 20, %s2305_s10 }
  0x12   : > { %s1965_s9 = scalar_lea.vmem %s2286_s1, %s1803_s30  ;;  %s1804_s13 = smul.u32 80, %s2303_s26 }
  0x13   : > { %v1753_v0 = vld [vmem:[%s1965_s9 + $0x38] sm:$0xff]  ;;  %v1752_v2 = vld [vmem:[%s1965_s9 + $0x30] sm:$0xff]  ;;  %v1751_v4 = vld [vmem:[%s1965_s9 + $0x28] sm:$0xff]  ;;  %s1988_s14 = scalar_lea.vmem %s2285_s0, %s1802_s11  ;;  %s1194_s16 = smul.f32 2.0, %s1193_s12 }
  0x14   : > { %v1761_v1 = vld [vmem:[%s1965_s9 + $0x78] sm:$0xff]  ;;  %1786 = vmatpush.bf16.msra.mxu2 %v1753_v0  ;;  %v1760_v3 = vld [vmem:[%s1965_s9 + $0x70] sm:$0xff]  ;;  %882 = vmatpush.bf16.msra.mxu0 %v1753_v0  ;;  %v1759_v5 = vld [vmem:[%s1965_s9 + $0x68] sm:$0xff]  ;;  %s298_s15 = sadd.s32 %s1804_s13, %s2305_s10 }
  0x15   : > { %1794 = vmatpush.bf16.msra.mxu3 %v1761_v1  ;;  %931 = vmatpush.bf16.msra.mxu1 %v1761_v1  ;;  %v1750_v6 = vld [vmem:[%s1965_s9 + $0x20] sm:$0xff]  ;;  %v1749_v8 = vld [vmem:[%s1965_s9 + $0x18] sm:$0xff]  ;;  %v1748_v10 = vld [vmem:[%s1965_s9 + $0x10] sm:$0xff]  ;;  %s1383_s17 = sshll.u32 %s298_s15, 3 }
  0x16   : > { %v1758_v7 = vld [vmem:[%s1965_s9 + $0x60] sm:$0xff]  ;;  %v1757_v9 = vld [vmem:[%s1965_s9 + $0x58] sm:$0xff]  ;;  %v1756_v11 = vld [vmem:[%s1965_s9 + $0x50] sm:$0xff]  ;;  %s2236_s20 = scalar_lea.vmem %s2291_s6, %s1383_s17 }
  0x17   : > { %v1747_v12 = vld [vmem:[%s1965_s9 + $0x8] sm:$0xff]  ;;  %v1746_v14 = vld [vmem:[%s1965_s9] sm:$0xff]  ;;  %v1728_v17 = vld [vmem:[%s1988_s14 + $0xb0] sm:$0xf0] }
  0x18   : > { %1787 = vmatpush.bf16.msra.mxu2 %v1752_v2  ;;  %883 = vmatpush.bf16.msra.mxu0 %v1752_v2  ;;  %v1755_v13 = vld [vmem:[%s1965_s9 + $0x48] sm:$0xff]  ;;  %v1754_v15 = vld [vmem:[%s1965_s9 + $0x40] sm:$0xff]  ;;  %v1468_v19 = vld [vmem:[%s1988_s14 + $0xb4] sm:$0xf0] }
  0x19   : > { %1795 = vmatpush.bf16.msra.mxu3 %v1760_v3  ;;  %932 = vmatpush.bf16.msra.mxu1 %v1760_v3  ;;  %v1466_v16 = vld [vmem:[%s1988_s14 + $0xa0] sm:$0xf]  ;;  %v1726_v18 = vld [vmem:[%s1988_s14 + $0xa4] sm:$0xf]  ;;  %v1769_v20 = vld [vmem:[%s1965_s9 + $0xb8] sm:$0xff] }
  0x1a   : > { %v1386_v21 = vld [vmem:[%s1988_s14] sm:$0xf]  ;;  %v1708_v22 = vld [vmem:[%s1988_s14 + $0x10] sm:$0xf0]  ;;  %v1777_v23 = vld [vmem:[%s1965_s9 + $0xf8] sm:$0xff]  ;;  %v1467_v26 = vor.u32 %v1728_v17, %v1466_v16  ;;  %v1471_v27 = vor.u32 %v1726_v18, %v1468_v19 }
  0x1b   : > { %v1706_v24 = vld [vmem:[%s1988_s14 + $0x4] sm:$0xf]  ;;  %v1388_v25 = vld [vmem:[%s1988_s14 + $0x14] sm:$0xf0]  ;;  %v1387_v28 = vor.u32 %v1708_v22, %v1386_v21  ;;  %v1768_v30 = vld [vmem:[%s1965_s9 + $0xb0] sm:$0xff] }
  0x1c   : > { %1788 = vmatpush.bf16.msra.mxu2 %v1751_v4  ;;  %884 = vmatpush.bf16.msra.mxu0 %v1751_v4  ;;  %v1391_v29 = vor.u32 %v1706_v24, %v1388_v25  ;;  %v1776_v31 = vld [vmem:[%s1965_s9 + $0xf0] sm:$0xff]  ;;  %v1785_v32 = vld [vmem:[%s1965_s9 + $0x138] sm:$0xff]  ;;  %v1767_v33 = vld [vmem:[%s1965_s9 + $0xa8] sm:$0xff] }
  0x1d   : > { %1796 = vmatpush.bf16.msra.mxu3 %v1759_v5  ;;  %933 = vmatpush.bf16.msra.mxu1 %v1759_v5  ;;  %v1775_v34 = vld [vmem:[%s1965_s9 + $0xe8] sm:$0xff]  ;;  %v1784_v35 = vld [vmem:[%s1965_s9 + $0x130] sm:$0xff]  ;;  %v1766_v36 = vld [vmem:[%s1965_s9 + $0xa0] sm:$0xff] }
  0x1e   : > { %v1774_v37 = vld [vmem:[%s1965_s9 + $0xe0] sm:$0xff]  ;;  %v1783_v38 = vld [vmem:[%s1965_s9 + $0x128] sm:$0xff]  ;;  %v1733_v40 = vld [vmem:[%s1988_s14 + $0xd8] sm:$0xf0] }
  0x1f   : > { %v1486_v39 = vld [vmem:[%s1988_s14 + $0xc8] sm:$0xf]  ;;  %v1731_v41 = vld [vmem:[%s1988_s14 + $0xcc] sm:$0xf]  ;;  %v1488_v42 = vld [vmem:[%s1988_s14 + $0xdc] sm:$0xf0] }
  0x20   : > { %1789 = vmatpush.bf16.msra.mxu2 %v1750_v6  ;;  %885 = vmatpush.bf16.msra.mxu0 %v1750_v6  ;;  %v1406_v43 = vld [vmem:[%s1988_s14 + $0x28] sm:$0xf]  ;;  %v1713_v44 = vld [vmem:[%s1988_s14 + $0x38] sm:$0xf0]  ;;  %v1711_v45 = vld [vmem:[%s1988_s14 + $0x2c] sm:$0xf]  ;;  %v1487_v50 = vor.u32 %v1733_v40, %v1486_v39  ;;  %v1491_v51 = vor.u32 %v1731_v41, %v1488_v42 }
  0x21   : > { %1797 = vmatpush.bf16.msra.mxu3 %v1758_v7  ;;  %934 = vmatpush.bf16.msra.mxu1 %v1758_v7  ;;  %v1765_v46 = vld [vmem:[%s1965_s9 + $0x98] sm:$0xff]  ;;  %v1408_v47 = vld [vmem:[%s1988_s14 + $0x3c] sm:$0xf0]  ;;  %v1407_v52 = vor.u32 %v1713_v44, %v1406_v43  ;;  %v1764_v54 = vld [vmem:[%s1965_s9 + $0x90] sm:$0xff] }
  0x22   : > { %v1773_v48 = vld [vmem:[%s1965_s9 + $0xd8] sm:$0xff]  ;;  %v1782_v49 = vld [vmem:[%s1965_s9 + $0x120] sm:$0xff]  ;;  %v1411_v53 = vor.u32 %v1711_v45, %v1408_v47  ;;  %v1772_v55 = vld [vmem:[%s1965_s9 + $0xd0] sm:$0xff] }
  0x23   : > { %v1781_v56 = vld [vmem:[%s1965_s9 + $0x118] sm:$0xff]  ;;  %v1763_v57 = vld [vmem:[%s1965_s9 + $0x88] sm:$0xff]  ;;  %v1780_v59 = vld [vmem:[%s1965_s9 + $0x110] sm:$0xff] }
  0x24   : > { %1790 = vmatpush.bf16.msra.mxu2 %v1749_v8  ;;  %886 = vmatpush.bf16.msra.mxu0 %v1749_v8  ;;  %v1771_v58 = vld [vmem:[%s1965_s9 + $0xc8] sm:$0xff]  ;;  %v1762_v60 = vld [vmem:[%s1965_s9 + $0x80] sm:$0xff]  ;;  %v1506_v63 = vld [vmem:[%s1988_s14 + $0xf0] sm:$0xf] }
  0x25   : > { %1798 = vmatpush.bf16.msra.mxu3 %v1757_v9  ;;  %935 = vmatpush.bf16.msra.mxu1 %v1757_v9  ;;  %v1770_v61 = vld [vmem:[%s1965_s9 + $0xc0] sm:$0xff]  ;;  %v1779_v62 = vld [vmem:[%s1965_s9 + $0x108] sm:$0xff]  ;;  %v1736_v1 = vld [vmem:[%s1988_s14 + $0xf4] sm:$0xf] }
  0x26   : > { %v1738_v0 = vld [vmem:[%s1988_s14 + $0x100] sm:$0xf0]  ;;  %v1508_v2 = vld [vmem:[%s1988_s14 + $0x104] sm:$0xf0]  ;;  %v1426_v3 = vld [vmem:[%s1988_s14 + $0x50] sm:$0xf] }
  0x27   : > { %v1718_v4 = vld [vmem:[%s1988_s14 + $0x60] sm:$0xf0]  ;;  %v1716_v5 = vld [vmem:[%s1988_s14 + $0x54] sm:$0xf]  ;;  %v1428_v6 = vld [vmem:[%s1988_s14 + $0x64] sm:$0xf0]  ;;  %v1507_v8 = vor.u32 %v1738_v0, %v1506_v63  ;;  %v1511_v9 = vor.u32 %v1736_v1, %v1508_v2 }
  0x28   : > { %1791 = vmatpush.bf16.msra.mxu2 %v1748_v10  ;;  %887 = vmatpush.bf16.msra.mxu0 %v1748_v10  ;;  %v1778_v7 = vld [vmem:[%s1965_s9 + $0x100] sm:$0xff]  ;;  %v1427_v10 = vor.u32 %v1718_v4, %v1426_v3  ;;  %v1446_v16 = vld [vmem:[%s1988_s14 + $0x78] sm:$0xf]  ;;  %v1723_v17 = vld [vmem:[%s1988_s14 + $0x88] sm:$0xf0] }
  0x29   : > { %1799 = vmatpush.bf16.msra.mxu3 %v1756_v11  ;;  %936 = vmatpush.bf16.msra.mxu1 %v1756_v11  ;;  %v1431_v11 = vor.u32 %v1716_v5, %v1428_v6  ;;  %v1721_v18 = vld [vmem:[%s1988_s14 + $0x7c] sm:$0xf]  ;;  %v1448_v19 = vld [vmem:[%s1988_s14 + $0x8c] sm:$0xf0]  ;;  %v1447_v22 = vor.u32 %v1723_v17, %v1446_v16  ;;  %v1394_v24 = vld [vmem:[%s1988_s14 + $0x8] sm:$0xf] }
  0x2a   : > { %v1709_v25 = vld [vmem:[%s1988_s14 + $0x18] sm:$0xf0]  ;;  %v1434_v42 = vld [vmem:[%s1988_s14 + $0x58] sm:$0xf]  ;;  %v1719_v43 = vld [vmem:[%s1988_s14 + $0x68] sm:$0xf0] }
  0x2b   : > { %v1717_v44 = vld [vmem:[%s1988_s14 + $0x5c] sm:$0xf]  ;;  %v1436_v45 = vld [vmem:[%s1988_s14 + $0x6c] sm:$0xf0]  ;;  %v1720_v47 = vld [vmem:[%s1988_s14 + $0x70] sm:$0xf0] }
  0x2c   : > { %1792 = vmatpush.bf16.msra.mxu2 %v1747_v12  ;;  %888 = vmatpush.bf16.msra.mxu0 %v1747_v12  ;;  %v1526_v12 = vld [vmem:[%s1988_s14 + $0x118] sm:$0xf]  ;;  %v1474_v63 = vld [vmem:[%s1988_s14 + $0xa8] sm:$0xf]  ;;  %v1729_v0 = vld [vmem:[%s1988_s14 + $0xb8] sm:$0xf0] }
  0x2d   : > { %1800 = vmatpush.bf16.msra.mxu3 %v1755_v13  ;;  %937 = vmatpush.bf16.msra.mxu1 %v1755_v13  ;;  %v1743_v13 = vld [vmem:[%s1988_s14 + $0x128] sm:$0xf0]  ;;  %v1476_v2 = vld [vmem:[%s1988_s14 + $0xbc] sm:$0xf0]  ;;  %v1482_v4 = vld [vmem:[%s1988_s14 + $0xb0] sm:$0xf]  ;;  %v1475_v6 = vor.u32 %v1729_v0, %v1474_v63 }
  0x2e   : > { %v1727_v1 = vld [vmem:[%s1988_s14 + $0xac] sm:$0xf]  ;;  %v1189_v3 = vld [vmem:[%s2288_s3 + $0x60] sm:$0xff] }
  0x2f   : > { %v1730_v5 = vld [vmem:[%s1988_s14 + $0xc0] sm:$0xf0]  ;;  %v1534_v0 = vld [vmem:[%s1988_s14 + $0x120] sm:$0xf] }
  0x30   : > { %1793 = vmatpush.bf16.msra.mxu2 %v1746_v14  ;;  %889 = vmatpush.bf16.msra.mxu0 %v1746_v14  ;;  %v1741_v14 = vld [vmem:[%s1988_s14 + $0x11c] sm:$0xf] }
  0x31   : > { %1801 = vmatpush.bf16.msra.mxu3 %v1754_v15  ;;  %938 = vmatpush.bf16.msra.mxu1 %v1754_v15  ;;  %v1528_v15 = vld [vmem:[%s1988_s14 + $0x12c] sm:$0xf0] }
  0x32   : > { %v1531_v21 = vor.u32 %v1741_v14, %v1528_v15 }
  0x33   : > { %910 = vmatmul.bf16.vlgmr.msra.gmra.mxu2 %v1467_v26  ;;  %890 = vmatmul.bf16.vlgmr.msra.gmra.mxu0 %v1387_v28  ;;  %v1707_v26 = vld [vmem:[%s1988_s14 + $0xc] sm:$0xf]  ;;  %v1402_v28 = vld [vmem:[%s1988_s14 + $0x10] sm:$0xf] }
  0x34   : > { %980 = vmatpush.bf16.msrb.mxu2 %v1769_v20  ;;  %959 = vmatmul.bf16.vlgmr.msra.gmra.mxu3 %v1471_v27  ;;  %v1527_v20 = vor.u32 %v1743_v13, %v1526_v12  ;;  %v1396_v27 = vld [vmem:[%s1988_s14 + $0x1c] sm:$0xf0]  ;;  %v1187_v12 = vld [vmem:[%s2288_s3 + $0x50] sm:$0xff] }
  0x35   : > { %1029 = vmatpush.bf16.msrb.mxu3 %v1777_v23  ;;  %939 = vmatmul.bf16.vlgmr.msra.gmra.mxu1 %v1391_v29  ;;  %v1451_v23 = vor.u32 %v1721_v18, %v1448_v19  ;;  %v1710_v29 = vld [vmem:[%s1988_s14 + $0x20] sm:$0xf0]  ;;  %v1186_v18 = vld [vmem:[%s2288_s3 + $0x48] sm:$0xff]  ;;  %v1494_v19 = vld [vmem:[%s1988_s14 + $0xd0] sm:$0xf] }
  0x36   : > { %1078 = vmatpush.bf16.msrb.mxu0 %v1785_v32  ;;  %v1403_v32 = vor.u32 %v1710_v29, %v1402_v28 }
  0x38   : > { %981 = vmatpush.bf16.msrb.mxu2 %v1768_v30  ;;  %v1395_v30 = vor.u32 %v1709_v25, %v1394_v24  ;;  %v1502_v24 = vld [vmem:[%s1988_s14 + $0xd8] sm:$0xf]  ;;  %v1735_v25 = vld [vmem:[%s1988_s14 + $0xe8] sm:$0xf0] }
  0x39   : > { %1030 = vmatpush.bf16.msrb.mxu3 %v1776_v31  ;;  %v1399_v31 = vor.u32 %v1707_v26, %v1396_v27 }
  0x3a   : > { %1079 = vmatpush.bf16.msrb.mxu0 %v1784_v35  ;;  %v1712_v35 = vld [vmem:[%s1988_s14 + $0x34] sm:$0xf] }
  0x3c   : > { %982 = vmatpush.bf16.msrb.mxu2 %v1767_v33  ;;  %v1414_v33 = vld [vmem:[%s1988_s14 + $0x30] sm:$0xf] }
  0x3d   : > { %1031 = vmatpush.bf16.msrb.mxu3 %v1775_v34  ;;  %v1714_v34 = vld [vmem:[%s1988_s14 + $0x40] sm:$0xf0] }
  0x3e   : > { %1080 = vmatpush.bf16.msrb.mxu0 %v1783_v38  ;;  %v1715_v38 = vld [vmem:[%s1988_s14 + $0x48] sm:$0xf0]  ;;  %v1415_v39 = vor.u32 %v1714_v34, %v1414_v33  ;;  %v1184_v34 = vld [vmem:[%s2288_s3 + $0x38] sm:$0xff] }
  0x40   : > { %983 = vmatpush.bf16.msrb.mxu2 %v1766_v36  ;;  %v1416_v36 = vld [vmem:[%s1988_s14 + $0x44] sm:$0xf0] }
  0x41   : > { %1032 = vmatpush.bf16.msrb.mxu3 %v1774_v37  ;;  %v1422_v37 = vld [vmem:[%s1988_s14 + $0x38] sm:$0xf]  ;;  %v1419_v40 = vor.u32 %v1712_v35, %v1416_v36  ;;  %v1183_v35 = vld [vmem:[%s2288_s3 + $0x30] sm:$0xff] }
  0x42   : > { %1081 = vmatpush.bf16.msrb.mxu0 %v1782_v49  ;;  %v1423_v41 = vor.u32 %v1715_v38, %v1422_v37  ;;  %v1439_v49 = vor.u32 %v1717_v44, %v1436_v45  ;;  %v1737_v44 = vld [vmem:[%s1988_s14 + $0xfc] sm:$0xf]  ;;  %v1516_v45 = vld [vmem:[%s1988_s14 + $0x10c] sm:$0xf0] }
  0x43   : > { %915 = vmatmul.bf16.gmra.mxu2 %v1487_v50  ;;  %895 = vmatmul.bf16.gmra.mxu0 %v1407_v52  ;;  %v1724_v52 = vld [vmem:[%s1988_s14 + $0x90] sm:$0xf0] }
  0x44   : > { %984 = vmatpush.bf16.msrb.mxu2 %v1765_v46  ;;  %964 = vmatmul.bf16.gmra.mxu3 %v1491_v51  ;;  %v1442_v46 = vld [vmem:[%s1988_s14 + $0x60] sm:$0xf] }
  0x45   : > { %1033 = vmatpush.bf16.msrb.mxu3 %v1773_v48  ;;  %944 = vmatmul.bf16.gmra.mxu1 %v1411_v53  ;;  %v1435_v48 = vor.u32 %v1719_v43, %v1434_v42  ;;  %v1443_v50 = vor.u32 %v1720_v47, %v1442_v46  ;;  %v1454_v51 = vld [vmem:[%s1988_s14 + $0x80] sm:$0xf]  ;;  %v1722_v53 = vld [vmem:[%s1988_s14 + $0x84] sm:$0xf]  ;;  %v1514_v42 = vld [vmem:[%s1988_s14 + $0xf8] sm:$0xf] }
  0x46   : > { %1082 = vmatpush.bf16.msrb.mxu0 %v1781_v56  ;;  %v1725_v56 = vld [vmem:[%s1988_s14 + $0x98] sm:$0xf0]  ;;  %v1739_v43 = vld [vmem:[%s1988_s14 + $0x108] sm:$0xf0]  ;;  %v1181_v46 = vld [vmem:[%s2288_s3 + $0x20] sm:$0xff] }
  0x47   : > { %v1522_v47 = vld [vmem:[%s1988_s14 + $0x100] sm:$0xf] }
  0x48   : > { %985 = vmatpush.bf16.msrb.mxu2 %v1764_v54  ;;  %v1456_v54 = vld [vmem:[%s1988_s14 + $0x94] sm:$0xf0] }
  0x49   : > { %1034 = vmatpush.bf16.msrb.mxu3 %v1772_v55  ;;  %v1462_v55 = vld [vmem:[%s1988_s14 + $0x88] sm:$0xf] }
  0x4a   : > { %1083 = vmatpush.bf16.msrb.mxu0 %v1780_v59  ;;  %v1463_v59 = vor.u32 %v1725_v56, %v1462_v55 }
  0x4c   : > { %986 = vmatpush.bf16.msrb.mxu2 %v1763_v57  ;;  %v1455_v57 = vor.u32 %v1724_v52, %v1454_v51  ;;  %v1515_v52 = vor.u32 %v1739_v43, %v1514_v42 }
  0x4d   : > { %1035 = vmatpush.bf16.msrb.mxu3 %v1771_v58  ;;  %v1459_v58 = vor.u32 %v1722_v53, %v1456_v54  ;;  %v1519_v53 = vor.u32 %v1737_v44, %v1516_v45 }
  0x4e   : > { %1084 = vmatpush.bf16.msrb.mxu0 %v1779_v62  ;;  %v1190_v62 = vld [vmem:[%s2288_s3 + $0x68] sm:$0xff] }
  0x50   : > { %987 = vmatpush.bf16.msrb.mxu2 %v1762_v60  ;;  %v1192_v60 = vld [vmem:[%s2288_s3 + $0x78] sm:$0xff] }
  0x51   : > { %1036 = vmatpush.bf16.msrb.mxu3 %v1770_v61  ;;  %1196 = vmatpush.msrb.mxu1 %v1192_v60  ;;  %v1191_v61 = vld [vmem:[%s2288_s3 + $0x70] sm:$0xff] }
  0x52   : > { %1085 = vmatpush.bf16.msrb.mxu0 %v1778_v7  ;;  %v1479_v7 = vor.u32 %v1727_v1, %v1476_v2  ;;  %v1178_v1 = vld [vmem:[%s2288_s3 + $0x8] sm:$0xff]  ;;  %v1177_v2 = vld [vmem:[%s2288_s3] sm:$0xff] }
  0x53   : > { %920 = vmatmul.bf16.gmra.mxu2 %v1507_v8  ;;  %900 = vmatmul.bf16.gmra.mxu0 %v1427_v10  ;;  %v1483_v8 = vor.u32 %v1730_v5, %v1482_v4  ;;  %v1188_v10 = vld [vmem:[%s2288_s3 + $0x58] sm:$0xff]  ;;  %v1742_v4 = vld [vmem:[%s1988_s14 + $0x124] sm:$0xf] }
  0x54   : > { %969 = vmatmul.bf16.gmra.mxu3 %v1511_v9  ;;  %1197 = vmatpush.msrb.mxu1 %v1191_v61  ;;  %v1536_v5 = vld [vmem:[%s1988_s14 + $0x134] sm:$0xf0] }
  0x55   : > { %949 = vmatmul.bf16.gmra.mxu1 %v1431_v11  ;;  %v2098_v11 = vld [vmem:[%s2287_s2] ss:$0 sm:$0xff] }
  0x56   : > { %1198 = vmatpush.msrb.mxu1 %v1190_v62 }
  0x58   : > { %1199 = vmatpush.msrb.mxu1 %v1189_v3  ;;  %v1744_v3 = vld [vmem:[%s1988_s14 + $0x130] sm:$0xf0] }
  0x5a   : > { %1200 = vmatpush.msrb.mxu1 %v1188_v10 }
  0x5c   : > { %1201 = vmatpush.msrb.mxu1 %v1187_v12 }
  0x5e   : > { %1202 = vmatpush.msrb.mxu1 %v1186_v18 }
  0x63   : > { %925 = vmatmul.bf16.gmra.mxu2 %v1527_v20  ;;  %905 = vmatmul.bf16.gmra.mxu0 %v1447_v22  ;;  %v1734_v20 = vld [vmem:[%s1988_s14 + $0xe0] sm:$0xf0]  ;;  %v1496_v22 = vld [vmem:[%s1988_s14 + $0xe4] sm:$0xf0] }
  0x64   : > { %974 = vmatmul.bf16.gmra.mxu3 %v1531_v21  ;;  %v1732_v21 = vld [vmem:[%s1988_s14 + $0xd4] sm:$0xf]  ;;  %v1495_v29 = vor.u32 %v1734_v20, %v1494_v19 }
  0x65   : > { %954 = vmatmul.bf16.gmra.mxu1 %v1451_v23  ;;  %v1185_v23 = vld [vmem:[%s2288_s3 + $0x40] sm:$0xff] }
  0x66   : > { %1203 = vmatpush.msrb.mxu1 %v1185_v23 }
  0x68   : > { %1204 = vmatpush.msrb.mxu1 %v1184_v34 }
  0x6a   : > { %1205 = vmatpush.msrb.mxu1 %v1183_v35 }
  0x73   : > { %988 = vmatmul.bf16.vlgmr.msrb.gmra.mxu2 %v1395_v30  ;;  %1086 = vmatmul.bf16.vlgmr.msrb.gmra.mxu0 %v1403_v32  ;;  %v1499_v30 = vor.u32 %v1732_v21, %v1496_v22 }
  0x74   : > { %1037 = vmatmul.bf16.vlgmr.msrb.gmra.mxu3 %v1399_v31  ;;  %v1503_v31 = vor.u32 %v1735_v25, %v1502_v24 }
  0x83   : > { %993 = vmatmul.bf16.gmra.mxu2 %v1415_v39  ;;  %1091 = vmatmul.bf16.gmra.mxu0 %v1423_v41  ;;  %v1182_v41 = vld [vmem:[%s2288_s3 + $0x28] sm:$0xff] }
  0x84   : > { %1042 = vmatmul.bf16.gmra.mxu3 %v1419_v40  ;;  %1206 = vmatpush.msrb.mxu1 %v1182_v41 }
  0x86   : > { %1207 = vmatpush.msrb.mxu1 %v1181_v46 }
  0x93   : > { %998 = vmatmul.bf16.gmra.mxu2 %v1435_v48  ;;  %1096 = vmatmul.bf16.gmra.mxu0 %v1443_v50  ;;  %v1740_v48 = vld [vmem:[%s1988_s14 + $0x110] sm:$0xf0] }
  0x94   : > { %1047 = vmatmul.bf16.gmra.mxu3 %v1439_v49  ;;  %v1523_v54 = vor.u32 %v1740_v48, %v1522_v47 }
  0xa3   : > { %1003 = vmatmul.bf16.gmra.mxu2 %v1455_v57  ;;  %1101 = vmatmul.bf16.gmra.mxu0 %v1463_v59  ;;  %v1180_v57 = vld [vmem:[%s2288_s3 + $0x18] sm:$0xff] }
  0xa4   : > { %1052 = vmatmul.bf16.gmra.mxu3 %v1459_v58  ;;  %v1179_v58 = vld [vmem:[%s2288_s3 + $0x10] sm:$0xff]  ;;  %1208 = vmatpush.msrb.mxu1 %v1180_v57 }
  0xa6   : > { %1209 = vmatpush.msrb.mxu1 %v1179_v58 }
  0xa8   : > { %1210 = vmatpush.msrb.mxu1 %v1178_v1 }
  0xaa   : > { %1211 = vmatpush.msrb.mxu1 %v1177_v2 }
  0xb0   : > { %v2090_v9 = vpop.f32.mrf.mxu0 }
  0xb2   : > { %v940_v20 = vpop.f32.mrf.mxu1 }
  0xb3   : > { %1008 = vmatmul.bf16.gmra.mxu2 %v1475_v6  ;;  %1106 = vmatmul.bf16.gmra.mxu0 %v1483_v8  ;;  %v1542_v6 = vld [vmem:[%s1988_s14 + $0x128] sm:$0xf] }
  0xb4   : > { %1057 = vmatmul.bf16.gmra.mxu3 %v1479_v7  ;;  %v1745_v7 = vld [vmem:[%s1988_s14 + $0x138] sm:$0xf0]  ;;  %s1127_s14 = sld [smem:[#allocation2]] }
  0xb6   : > { %v911_v13 = vpop.f32.mrf.mxu2 }
  0xb7   : > { %v960_v14 = vpop.f32.mrf.mxu3  ;;  %v912_v15 = vadd.f32 %v2098_v11, %v911_v13  ;;  %v1535_v13 = vor.u32 %v1744_v3, %v1534_v0 }
  0xb8   : > { %v2106_v17 = vpop.f32.mrf.mxu0 }
  0xb9   : > { %v2104_v16 = vadd.f32 %v960_v14, %v912_v15  ;;  %v1539_v14 = vor.u32 %v1742_v4, %v1536_v5  ;;  %v1543_v15 = vor.u32 %v1745_v7, %v1542_v6  ;;  %v894_v42 = vadd.f32 %v2098_v11, %v2106_v17 }
  0xba   : > { %v2193_v45 = vstv %s1127_s14 }
  0xbe   : > { %v913_v26 = vpop.f32.mrf.mxu2 }
  0xbf   : > { %v962_v27 = vpop.f32.mrf.mxu3  ;;  %v914_v28 = vadd.f32 %v2098_v11, %v913_v26  ;;  %v942_v26 = vpop.f32.mrf.mxu1 }
  0xc0   : > { %v2123_v33 = vpop.f32.mrf.mxu0  ;;  %v943_v47 = vadd.f32 %v942_v26, %v894_v42 }
  0xc1   : > { %v2121_v32 = vadd.f32 %v962_v27, %v914_v28 }
  0xc3   : > { %1013 = vmatmul.bf16.gmra.mxu2 %v1495_v29  ;;  %1111 = vmatmul.bf16.gmra.mxu0 %v1503_v31 }
  0xc4   : > { %1062 = vmatmul.bf16.gmra.mxu3 %v1499_v30  ;;  %v892_v30 = vadd.f32 %v2098_v11, %v2090_v9 }
  0xc6   : > { %v916_v36 = vpop.f32.mrf.mxu2  ;;  %v941_v35 = vadd.f32 %v940_v20, %v892_v30 }
  0xc7   : > { %v965_v37 = vpop.f32.mrf.mxu3  ;;  %v917_v38 = vadd.f32 %v2098_v11, %v916_v36 }
  0xc8   : > { %v2134_v40 = vpop.f32.mrf.mxu0 }
  0xc9   : > { %v2132_v39 = vadd.f32 %v965_v37, %v917_v38  ;;  %v945_v38 = vpop.f32.mrf.mxu1  ;;  %v899_v2 = vadd.f32 %v2098_v11, %v2134_v40 }
  0xce   : > { %v918_v49 = vpop.f32.mrf.mxu2 }
  0xcf   : > { %v967_v50 = vpop.f32.mrf.mxu3  ;;  %v919_v51 = vadd.f32 %v2098_v11, %v918_v49 }
  0xd0   : > { %v2151_v56 = vpop.f32.mrf.mxu0 }
  0xd1   : > { %v2149_v55 = vadd.f32 %v967_v50, %v919_v51 }
  0xd3   : > { %1018 = vmatmul.bf16.gmra.mxu2 %v1515_v52  ;;  %1116 = vmatmul.bf16.gmra.mxu0 %v1523_v54  ;;  %v897_v52 = vadd.f32 %v2098_v11, %v2123_v33 }
  0xd4   : > { %1067 = vmatmul.bf16.gmra.mxu3 %v1519_v53  ;;  %v947_v53 = vpop.f32.mrf.mxu1 }
  0xd5   : > { %v946_v58 = vadd.f32 %v945_v38, %v897_v52  ;;  %v948_v6 = vadd.f32 %v947_v53, %v899_v2 }
  0xd6   : > { %v921_v59 = vpop.f32.mrf.mxu2 }
  0xd7   : > { %v970_v60 = vpop.f32.mrf.mxu3  ;;  %v922_v61 = vadd.f32 %v2098_v11, %v921_v59 }
  0xd8   : > { %v2162_v63 = vpop.f32.mrf.mxu0 }
  0xd9   : > { %v2160_v62 = vadd.f32 %v970_v60, %v922_v61  ;;  %v904_v30 = vadd.f32 %v2098_v11, %v2162_v63 }
  0xdc   : > { %v950_v5 = vpop.f32.mrf.mxu1 }
  0xde   : > { %v923_v8 = vpop.f32.mrf.mxu2 }
  0xdf   : > { %v972_v10 = vpop.f32.mrf.mxu3  ;;  %v924_v12 = vadd.f32 %v2098_v11, %v923_v8 }
  0xe0   : > { %v2179_v19 = vpop.f32.mrf.mxu0 }
  0xe1   : > { %v2177_v18 = vadd.f32 %v972_v10, %v924_v12 }
  0xe3   : > { %1023 = vmatmul.bf16.gmra.mxu2 %v1535_v13  ;;  %1121 = vmatmul.bf16.gmra.mxu0 %v1543_v15 }
  0xe4   : > { %1072 = vmatmul.bf16.gmra.mxu3 %v1539_v14  ;;  %v902_v14 = vadd.f32 %v2098_v11, %v2151_v56 }
  0xe6   : > { %v926_v21 = vpop.f32.mrf.mxu2  ;;  %v951_v40 = vadd.f32 %v950_v5, %v902_v14 }
  0xe7   : > { %v975_v22 = vpop.f32.mrf.mxu3  ;;  %v927_v23 = vadd.f32 %v2098_v11, %v926_v21 }
  0xe8   : > { %v2184_v25 = vpop.f32.mrf.mxu0 }
  0xe9   : > { %v2182_v24 = vadd.f32 %v975_v22, %v927_v23  ;;  %v952_v22 = vpop.f32.mrf.mxu1 }
  0xea   : > { %v953_v56 = vadd.f32 %v952_v22, %v904_v30 }
  0xee   : > { %v928_v27 = vpop.f32.mrf.mxu2 }
  0xef   : > { %v977_v28 = vpop.f32.mrf.mxu3  ;;  %v929_v29 = vadd.f32 %v2098_v11, %v928_v27 }
  0xf0   : > { %v1087_v34 = vpop.f32.mrf.mxu0 }
  0xf1   : > { %v2189_v31 = vadd.f32 %v977_v28, %v929_v29 }
  0xf6   : > { %v989_v36 = vpop.f32.mrf.mxu2 }
  0xf7   : > { %v1038_v37 = vpop.f32.mrf.mxu3  ;;  %v990_v41 = vadd.f32 %v989_v36, %v941_v35 }
  0xf8   : > { %v1089_v44 = vpop.f32.mrf.mxu0 }
  0xf9   : > { %v1039_v43 = vadd.f32 %v1038_v37, %v990_v41 }
  0xfb   : > { %v1088_v46 = vadd.f32 %v1087_v34, %v1039_v43 }
  0xfd   : > { %vm1128_vm0 = vcmp.gt.f32.partialorder %v1088_v46, 0.0  ;;  %v1145_v9 = vmul.f32 %v2193_v45, %v1088_v46 }
  0xfe   : > { %v991_v48 = vpop.f32.mrf.mxu2 }
  0xff   : > { %v1040_v49 = vpop.f32.mrf.mxu3  ;;  %v992_v50 = vadd.f32 %v991_v48, %v943_v47  ;;  %v1161_v51 = vsel %vm1128_vm0, %v1088_v46, %v1145_v9  ;;  %v907_v46 = vadd.f32 %v2098_v11, %v2179_v19  ;;  %vm1261_vm0 = vcmask 7168  }
 0x100   : > { %1212 = vmatmul.f32.vlgmr.msrb.gmra.mxu1 %v1161_v51  ;;  %v1092_v17 = vpop.f32.mrf.mxu0 }
 0x101   : > { %v1041_v54 = vadd.f32 %v1040_v49, %v992_v50 }
 0x103   : > { %v1090_v57 = vadd.f32 %v1089_v44, %v1041_v54  ;;  %v955_v44 = vpop.f32.mrf.mxu1  ;;  %v909_v54 = vadd.f32 %v2098_v11, %v2184_v25 }
 0x104   : > { %v956_v63 = vadd.f32 %v955_v44, %v907_v46 }
 0x105   : > { %vm1129_vm1 = vcmp.gt.f32.partialorder %v1090_v57, 0.0  ;;  %v1146_v59 = vmul.f32 %v2193_v45, %v1090_v57 }
 0x106   : > { %v994_v60 = vpop.f32.mrf.mxu2 }
 0x107   : > { %v1043_v61 = vpop.f32.mrf.mxu3  ;;  %v995_v0 = vadd.f32 %v994_v60, %v946_v58  ;;  %v1162_v1 = vsel %vm1129_vm1, %v1090_v57, %v1146_v59 }
 0x108   : > { %1215 = vmatmul.f32.gmra.mxu1 %v1162_v1  ;;  %v1094_v4 = vpop.f32.mrf.mxu0 }
 0x109   : > { %v1044_v3 = vadd.f32 %v1043_v61, %v995_v0 }
 0x10b   : > { %v1093_v33 = vadd.f32 %v1092_v17, %v1044_v3  ;;  %v957_v58 = vpop.f32.mrf.mxu1 }
 0x10c   : > { %v958_v19 = vadd.f32 %v957_v58, %v909_v54 }
 0x10d   : > { %vm1130_vm2 = vcmp.gt.f32.partialorder %v1093_v33, 0.0  ;;  %v1147_v7 = vmul.f32 %v2193_v45, %v1093_v33 }
 0x10e   : > { %v996_v8 = vpop.f32.mrf.mxu2 }
 0x10f   : > { %v1045_v10 = vpop.f32.mrf.mxu3  ;;  %v997_v12 = vadd.f32 %v996_v8, %v948_v6  ;;  %v1163_v13 = vsel %vm1130_vm2, %v1093_v33, %v1147_v7 }
 0x110   : > { %1218 = vmatmul.f32.gmra.mxu1 %v1163_v13  ;;  %v1097_v20 = vpop.f32.mrf.mxu0 }
 0x111   : > { %v1046_v15 = vadd.f32 %v1045_v10, %v997_v12 }
 0x113   : > { %v1095_v21 = vadd.f32 %v1094_v4, %v1046_v15 }
 0x115   : > { %vm1131_vm3 = vcmp.gt.f32.partialorder %v1095_v21, 0.0  ;;  %v1148_v23 = vmul.f32 %v2193_v45, %v1095_v21 }
 0x116   : > { %v999_v26 = vpop.f32.mrf.mxu2 }
 0x117   : > { %v1048_v27 = vpop.f32.mrf.mxu3  ;;  %v1000_v28 = vadd.f32 %v999_v26, %v951_v40  ;;  %v1164_v29 = vsel %vm1131_vm3, %v1095_v21, %v1148_v23 }
 0x118   : > { %1221 = vmatmul.f32.gmra.mxu1 %v1164_v29  ;;  %v1099_v35 = vpop.f32.mrf.mxu0 }
 0x119   : > { %v1049_v34 = vadd.f32 %v1048_v27, %v1000_v28 }
 0x11b   : > { %v1098_v36 = vadd.f32 %v1097_v20, %v1049_v34 }
 0x11d   : > { %vm1132_vm4 = vcmp.gt.f32.partialorder %v1098_v36, 0.0  ;;  %v1149_v37 = vmul.f32 %v2193_v45, %v1098_v36 }
 0x11e   : > { %v1001_v38 = vpop.f32.mrf.mxu2 }
 0x11f   : > { %v1050_v41 = vpop.f32.mrf.mxu3  ;;  %v1002_v42 = vadd.f32 %v1001_v38, %v953_v56  ;;  %v1165_v43 = vsel %vm1132_vm4, %v1098_v36, %v1149_v37 }
 0x120   : > { %1224 = vmatmul.f32.gmra.mxu1 %v1165_v43  ;;  %v1102_v9 = vpop.f32.mrf.mxu0 }
 0x121   : > { %v1051_v47 = vadd.f32 %v1050_v41, %v1002_v42 }
 0x123   : > { %v1100_v48 = vadd.f32 %v1099_v35, %v1051_v47 }
 0x125   : > { %vm1133_vm5 = vcmp.gt.f32.partialorder %v1100_v48, 0.0  ;;  %v1150_v49 = vmul.f32 %v2193_v45, %v1100_v48 }
 0x126   : > { %v1004_v50 = vpop.f32.mrf.mxu2 }
 0x127   : > { %v1053_v51 = vpop.f32.mrf.mxu3  ;;  %v1005_v52 = vadd.f32 %v1004_v50, %v956_v63  ;;  %v1166_v53 = vsel %vm1133_vm5, %v1100_v48, %v1150_v49 }
 0x128   : > { %1227 = vmatmul.f32.gmra.mxu1 %v1166_v53  ;;  %v1104_v57 = vpop.f32.mrf.mxu0 }
 0x129   : > { %v1054_v17 = vadd.f32 %v1053_v51, %v1005_v52 }
 0x12b   : > { %v1103_v59 = vadd.f32 %v1102_v9, %v1054_v17 }
 0x12d   : > { %vm1134_vm6 = vcmp.gt.f32.partialorder %v1103_v59, 0.0  ;;  %v1151_v60 = vmul.f32 %v2193_v45, %v1103_v59 }
 0x12e   : > { %v1006_v61 = vpop.f32.mrf.mxu2 }
 0x12f   : > { %v1055_v0 = vpop.f32.mrf.mxu3  ;;  %v1007_v1 = vadd.f32 %v1006_v61, %v958_v19  ;;  %v1167_v2 = vsel %vm1134_vm6, %v1103_v59, %v1151_v60 }
 0x130   : > { %1230 = vmatmul.f32.gmra.mxu1 %v1167_v2  ;;  %v1107_v4 = vpop.f32.mrf.mxu0 }
 0x131   : > { %v1056_v3 = vadd.f32 %v1055_v0, %v1007_v1 }
 0x133   : > { %v1105_v5 = vadd.f32 %v1104_v57, %v1056_v3 }
 0x135   : > { %vm1135_vm7 = vcmp.gt.f32.partialorder %v1105_v5, 0.0  ;;  %v1152_v33 = vmul.f32 %v2193_v45, %v1105_v5 }
 0x136   : > { %v1009_v11 = vpop.f32.mrf.mxu2 }
 0x137   : > { %v1058_v25 = vpop.f32.mrf.mxu3  ;;  %v1010_v6 = vadd.f32 %v1009_v11, %v2104_v16  ;;  %v1168_v7 = vsel %vm1135_vm7, %v1105_v5, %v1152_v33 }
 0x138   : > { %1233 = vmatmul.f32.gmra.mxu1 %v1168_v7  ;;  %v1109_v10 = vpop.f32.mrf.mxu0 }
 0x139   : > { %v1059_v8 = vadd.f32 %v1058_v25, %v1010_v6  ;;  %v1195_v6 = vstv %s1194_s16 }
 0x13b   : > { %v1108_v12 = vadd.f32 %v1107_v4, %v1059_v8 }
 0x13d   : > { %vm1136_vm8 = vcmp.gt.f32.partialorder %v1108_v12, 0.0  ;;  %v1153_v13 = vmul.f32 %v2193_v45, %v1108_v12 }
 0x13e   : > { %v1011_v14 = vpop.f32.mrf.mxu2 }
 0x13f   : > { %v1060_v15 = vpop.f32.mrf.mxu3  ;;  %v1012_v20 = vadd.f32 %v1011_v14, %v2121_v32  ;;  %v1169_v21 = vsel %vm1136_vm8, %v1108_v12, %v1153_v13 }
 0x140   : > { %1236 = vmatmul.f32.gmra.mxu1 %v1169_v21  ;;  %v1112_v22 = vpop.f32.mrf.mxu0 }
 0x141   : > { %v1061_v40 = vadd.f32 %v1060_v15, %v1012_v20 }
 0x143   : > { %v1110_v23 = vadd.f32 %v1109_v10, %v1061_v40 }
 0x145   : > { %vm1137_vm9 = vcmp.gt.f32.partialorder %v1110_v23, 0.0  ;;  %v1154_v16 = vmul.f32 %v2193_v45, %v1110_v23 }
 0x146   : > { %v1014_v26 = vpop.f32.mrf.mxu2 }
 0x147   : > { %v1063_v27 = vpop.f32.mrf.mxu3  ;;  %v1015_v28 = vadd.f32 %v1014_v26, %v2132_v39  ;;  %v1170_v29 = vsel %vm1137_vm9, %v1110_v23, %v1154_v16 }
 0x148   : > { %1239 = vmatmul.f32.gmra.mxu1 %v1170_v29  ;;  %v1114_v34 = vpop.f32.mrf.mxu0 }
 0x149   : > { %v1064_v30 = vadd.f32 %v1063_v27, %v1015_v28 }
 0x14b   : > { %v1113_v35 = vadd.f32 %v1112_v22, %v1064_v30 }
 0x14d   : > { %vm1138_vm10 = vcmp.gt.f32.partialorder %v1113_v35, 0.0  ;;  %v1155_v32 = vmul.f32 %v2193_v45, %v1113_v35 }
 0x14e   : > { %v1016_v36 = vpop.f32.mrf.mxu2 }
 0x14f   : > { %v1065_v56 = vpop.f32.mrf.mxu3  ;;  %v1017_v37 = vadd.f32 %v1016_v36, %v2149_v55  ;;  %v1171_v38 = vsel %vm1138_vm10, %v1113_v35, %v1155_v32 }
 0x150   : > { %1242 = vmatmul.f32.gmra.mxu1 %v1171_v38  ;;  %v1117_v43 = vpop.f32.mrf.mxu0 }
 0x151   : > { %v1066_v41 = vadd.f32 %v1065_v56, %v1017_v37 }
 0x153   : > { %v1115_v42 = vadd.f32 %v1114_v34, %v1066_v41 }
 0x155   : > { %vm1139_vm11 = vcmp.gt.f32.partialorder %v1115_v42, 0.0  ;;  %v1156_v39 = vmul.f32 %v2193_v45, %v1115_v42 }
 0x156   : > { %v1019_v44 = vpop.f32.mrf.mxu2 }
 0x157   : > { %v1068_v46 = vpop.f32.mrf.mxu3  ;;  %v1020_v47 = vadd.f32 %v1019_v44, %v2160_v62  ;;  %v1172_v9 = vsel %vm1139_vm11, %v1115_v42, %v1156_v39 }
 0x158   : > { %1245 = vmatmul.f32.gmra.mxu1 %v1172_v9  ;;  %v1119_v49 = vpop.f32.mrf.mxu0 }
 0x159   : > { %v1069_v48 = vadd.f32 %v1068_v46, %v1020_v47 }
 0x15b   : > { %v1118_v63 = vadd.f32 %v1117_v43, %v1069_v48 }
 0x15d   : > { %vm1140_vm12 = vcmp.gt.f32.partialorder %v1118_v63, 0.0  ;;  %v1157_v55 = vmul.f32 %v2193_v45, %v1118_v63 }
 0x15e   : > { %v1021_v50 = vpop.f32.mrf.mxu2 }
 0x15f   : > { %v1070_v51 = vpop.f32.mrf.mxu3  ;;  %v1022_v52 = vadd.f32 %v1021_v50, %v2177_v18  ;;  %v1173_v53 = vsel %vm1140_vm12, %v1118_v63, %v1157_v55 }
 0x160   : > { %1248 = vmatmul.f32.gmra.mxu1 %v1173_v53  ;;  %v1122_v60 = vpop.f32.mrf.mxu0 }
 0x161   : > { %v1071_v54 = vadd.f32 %v1070_v51, %v1022_v52 }
 0x163   : > { %v1120_v17 = vadd.f32 %v1119_v49, %v1071_v54 }
 0x165   : > { %vm1141_vm13 = vcmp.gt.f32.partialorder %v1120_v17, 0.0  ;;  %v1158_v57 = vmul.f32 %v2193_v45, %v1120_v17 }
 0x166   : > { %v1024_v62 = vpop.f32.mrf.mxu2 }
 0x167   : > { %v1073_v58 = vpop.f32.mrf.mxu3  ;;  %v1025_v59 = vadd.f32 %v1024_v62, %v2182_v24  ;;  %v1174_v19 = vsel %vm1141_vm13, %v1120_v17, %v1158_v57 }
 0x168   : > { %1251 = vmatmul.f32.gmra.mxu1 %v1174_v19  ;;  %v1124_v33 = vpop.f32.mrf.mxu0 }
 0x169   : > { %v1074_v61 = vadd.f32 %v1073_v58, %v1025_v59 }
 0x16b   : > { %v1123_v0 = vadd.f32 %v1122_v60, %v1074_v61 }
 0x16d   : > { %vm1142_vm14 = vcmp.gt.f32.partialorder %v1123_v0, 0.0  ;;  %v1159_v18 = vmul.f32 %v2193_v45, %v1123_v0 }
 0x16e   : > { %v1026_v1 = vpop.f32.mrf.mxu2 }
 0x16f   : > { %v1027_v2 = vadd.f32 %v1026_v1, %v2189_v31  ;;  %v1175_v3 = vsel %vm1142_vm14, %v1123_v0, %v1159_v18  ;;  %v1075_v4 = vpop.f32.mrf.mxu3 }
 0x170   : > { %1254 = vmatmul.f32.gmra.mxu1 %v1175_v3 }
 0x171   : > { %v1076_v5 = vadd.f32 %v1075_v4, %v1027_v2 }
 0x173   : > { %v1125_v24 = vadd.f32 %v1124_v33, %v1076_v5 }
 0x175   : > { %vm1143_vm15 = vcmp.gt.f32.partialorder %v1125_v24, 0.0  ;;  %v1160_v11 = vmul.f32 %v2193_v45, %v1125_v24 }
 0x177   : > { %v1176_v25 = vsel %vm1143_vm15, %v1125_v24, %v1160_v11 }
 0x178   : > { %1257 = vmatmul.f32.gmra.mxu1 %v1176_v25 }
 0x17d   : > { %v1213_v31 = vpop.f32.mrf.mxu1 }
 0x17e   : > { %v1214_v7 = vadd.f32 %v1213_v31, %v1195_v6 }
 0x180   : > { %1262 = vst.msk [vmem:[%s2236_s20] sm:$0xff] %vm1261_vm0, %v1214_v7 }
 0x185   : > { %v1216_v45 = vpop.f32.mrf.mxu1 }
 0x186   : > { %v1217_v8 = vadd.f32 %v1216_v45, %v1195_v6 }
 0x188   : > { %1263 = vst.msk [vmem:[%s2236_s20 + $0x8] sm:$0xff] %vm1261_vm0, %v1217_v8 }
 0x18d   : > { %v1219_v10 = vpop.f32.mrf.mxu1 }
 0x18e   : > { %v1220_v12 = vadd.f32 %v1219_v10, %v1195_v6 }
 0x190   : > { %1264 = vst.msk [vmem:[%s2236_s20 + $0x10] sm:$0xff] %vm1261_vm0, %v1220_v12 }
 0x195   : > { %v1222_v13 = vpop.f32.mrf.mxu1 }
 0x196   : > { %v1223_v14 = vadd.f32 %v1222_v13, %v1195_v6 }
 0x198   : > { %1265 = vst.msk [vmem:[%s2236_s20 + $0x18] sm:$0xff] %vm1261_vm0, %v1223_v14 }
 0x19d   : > { %v1225_v15 = vpop.f32.mrf.mxu1 }
 0x19e   : > { %v1226_v20 = vadd.f32 %v1225_v15, %v1195_v6 }
 0x1a0   : > { %1266 = vst.msk [vmem:[%s2236_s20 + $0x20] sm:$0xff] %vm1261_vm0, %v1226_v20 }
 0x1a5   : > { %v1228_v21 = vpop.f32.mrf.mxu1 }
 0x1a6   : > { %v1229_v40 = vadd.f32 %v1228_v21, %v1195_v6 }
 0x1a8   : > { %1267 = vst.msk [vmem:[%s2236_s20 + $0x28] sm:$0xff] %vm1261_vm0, %v1229_v40 }
 0x1ad   : > { %v1231_v22 = vpop.f32.mrf.mxu1 }
 0x1ae   : > { %v1232_v23 = vadd.f32 %v1231_v22, %v1195_v6 }
 0x1b0   : > { %1268 = vst.msk [vmem:[%s2236_s20 + $0x30] sm:$0xff] %vm1261_vm0, %v1232_v23 }
 0x1b5   : > { %v1234_v16 = vpop.f32.mrf.mxu1 }
 0x1b6   : > { %v1235_v26 = vadd.f32 %v1234_v16, %v1195_v6 }
 0x1b8   : > { %1269 = vst.msk [vmem:[%s2236_s20 + $0x38] sm:$0xff] %vm1261_vm0, %v1235_v26 }
 0x1bd   : > { %v1237_v27 = vpop.f32.mrf.mxu1 }
 0x1be   : > { %v1238_v28 = vadd.f32 %v1237_v27, %v1195_v6 }
 0x1c0   : > { %1270 = vst.msk [vmem:[%s2236_s20 + $0x40] sm:$0xff] %vm1261_vm0, %v1238_v28 }
 0x1c5   : > { %v1240_v29 = vpop.f32.mrf.mxu1 }
 0x1c6   : > { %v1241_v30 = vadd.f32 %v1240_v29, %v1195_v6 }
 0x1c8   : > { %1271 = vst.msk [vmem:[%s2236_s20 + $0x48] sm:$0xff] %vm1261_vm0, %v1241_v30 }
 0x1cd   : > { %v1243_v34 = vpop.f32.mrf.mxu1 }
 0x1ce   : > { %v1244_v35 = vadd.f32 %v1243_v34, %v1195_v6 }
 0x1d0   : > { %1272 = vst.msk [vmem:[%s2236_s20 + $0x50] sm:$0xff] %vm1261_vm0, %v1244_v35 }
 0x1d5   : > { %v1246_v32 = vpop.f32.mrf.mxu1 }
 0x1d6   : > { %v1247_v36 = vadd.f32 %v1246_v32, %v1195_v6 }
 0x1d8   : > { %1273 = vst.msk [vmem:[%s2236_s20 + $0x58] sm:$0xff] %vm1261_vm0, %v1247_v36 }
 0x1dd   : > { %v1249_v56 = vpop.f32.mrf.mxu1 }
 0x1de   : > { %v1250_v37 = vadd.f32 %v1249_v56, %v1195_v6 }
 0x1e0   : > { %1274 = vst.msk [vmem:[%s2236_s20 + $0x60] sm:$0xff] %vm1261_vm0, %v1250_v37 }
 0x1e5   : > { %v1252_v38 = vpop.f32.mrf.mxu1 }
 0x1e6   : > { %v1253_v41 = vadd.f32 %v1252_v38, %v1195_v6 }
 0x1e8   : > { %1275 = vst.msk [vmem:[%s2236_s20 + $0x68] sm:$0xff] %vm1261_vm0, %v1253_v41 }
 0x1ed   : > { %v1255_v42 = vpop.f32.mrf.mxu1 }
 0x1ee   : > { %v1256_v43 = vadd.f32 %v1255_v42, %v1195_v6 }
 0x1f0   : > { %1276 = vst.msk [vmem:[%s2236_s20 + $0x70] sm:$0xff] %vm1261_vm0, %v1256_v43 }
 0x1f5   : > { %v1258_v39 = vpop.f32.mrf.mxu1 }
 0x1f6   : > { %v1259_v44 = vadd.f32 %v1258_v39, %v1195_v6 }
 0x1f8   : > { %1277 = vst.msk [vmem:[%s2236_s20 + $0x78] sm:$0xff] %vm1261_vm0, %v1259_v44 }
 0x1f9 PF: > { %s18_s29 = sadd.s32 1, %s1884_s29   ;;  %s2292_s25 = smov %s1876_s27 }
 0x1fa   : > { %p15_p7 = scmp.ge.s32.totalorder %s18_s29, 12   ;;  %s2293_s26 = smov %s1880_s28 }
 0x1fb   : > { %s2294_s27 = smov %s2297_s4  ;;  %s2295_s28 = smov %s2301_s5 }
 0x1fc   :  { %17 = sbr.rel (!%p15_p7) target bundleno = 4 (0x4), region = 77 }

// kernel: squeeze.15
= control target key start
LH: loop header
LB: loop body
LE: loop exit
PB: predicated region body
PF: predicated region fallthrough
CT: control target
= control target key end

     0   :  { %s202_s0 = inlined_call_operand.vmem [shape: f32[2,600], index: 0, kind: input, shape index: {}]   ;;  %s203_s1 = inlined_call_operand.hbm [shape: f32[1,1200], index: 1, kind: output, shape index: {}]  }
   0x1   :  { %v137_v0 = vld [vmem:[%s202_s0 + $0x8] sm:$0x3]  ;;  %v138_v1 = vld [vmem:[%s202_s0 + $0x6] sm:$0x3]  ;;  %v139_v2 = vld [vmem:[%s202_s0 + $0x4] sm:$0x3] }
   0x2   :  { %8 = vst [vmem:[#allocation3 + $0x20] sm:$0x3] %v137_v0  ;;  %v140_v3 = vld [vmem:[%s202_s0 + $0x2] sm:$0x3]  ;;  %v21_v4 = vld [vmem:[%s202_s0] sm:$0x3] }
   0x3   :  { %12 = vst [vmem:[#allocation3 + $0x18] sm:$0x3] %v138_v1 }
   0x4   :  { %16 = vst [vmem:[#allocation3 + $0x10] sm:$0x3] %v139_v2 }
   0x5   :  { %20 = vst [vmem:[#allocation3 + $0x8] sm:$0x3] %v140_v3 }
   0x6   :  { %2 = vsyncpa [#allocation1], 0  ;;  %22 = vst [vmem:[#allocation3] sm:$0x3] %v21_v4  ;;  %vm36_vm0 = vcmask 1044484   ;;  %vm38_vm1 = vcmask 326656  }
   0x7   :  { %s51_s0 = smov 3  ;;  %s54_s16 = smov 12  ;;  %vm56_vm2 = vcmask 1043458   ;;  %vm25_vm3 = vcmask 719872   ;;  %vm42_vm4 = vcmask 392192   ;;  %vm45_vm5 = vcmask 1048256  }
   0x8   :  { %s169_s17 = smov 88   ;;  %s170_s18 = smov [#allocation0]  }
   0x9   :  { %v35_v5 = vld [vmem:[#allocation3 + $0x1d] sm:$0x10]   ;;  %v24_v14 = vld [vmem:[#allocation3 + $0x20] sm:$0x1]   ;;  %s128_s19 = sshll.u32 %s170_s18, 4  ;;  %s130_s1 = sshll.u32 %s203_s1, 4  ;;  %s129_s19 = int_to_ptr.vmem [resolvable:$true] %s128_s19  ;;  %s131_s1 = int_to_ptr.hbm [resolvable:$true] %s130_s1 }
   0xa   :  { %v31_v6 = vld [vmem:[#allocation3 + $0x21] sm:$0x1]   ;;  %27 = vst.msk [vmem:[#allocation2 + $0x20] sm:$0x1] %vm25_vm3, %v24_v14  }
   0xd   :  { %v33_v7 = vld [vmem:[#allocation3 + $0x1] ss:$8 sm:$0xf]   ;;  %v28_v8 = vld [vmem:[#allocation3] ss:$8 sm:$0xf]  }
   0xe   :  { %v37_v9 = vsel %vm36_vm0, %v35_v5, %v33_v7  ;;  %29 = vst [vmem:[#allocation2] ss:$8 sm:$0xf] %v28_v8   ;;  %v52_v11 = vld [vmem:[#allocation3 + $0x19] ss:$-24 sm:%s51_s0]  }
   0xf   :  { %v39_v10 = vsel %vm38_vm1, %v37_v9, %v31_v6  ;;  %v55_v12 = vld [vmem:[#allocation3 - $0x7] ss:$8 sm:%s54_s16]  }
  0x10   :  { %40 = vrot.lane.b32.xlu0 %v39_v10, %s169_s17  ;;  %v57_v13 = vsel %vm56_vm2, %v55_v12, %v52_v11 }
  0x15   :  { %v67_v15 = vld [vmem:[#allocation2] sm:$0x1]  ;;  %v72_v16 = vld [vmem:[#allocation2 + $0x8] sm:$0x1]  ;;  %v78_v17 = vld [vmem:[#allocation2 + $0x10] sm:$0x1] }
  0x16   :  { %70 = vst [vmem:[#allocation0] sm:$0x1] %v67_v15  ;;  %v84_v18 = vld [vmem:[#allocation2 + $0x18] sm:$0x1] }
  0x17   :  { %76 = vst [vmem:[#allocation0 + $0x1] sm:$0x1] %v72_v16 }
  0x18   :  { %58 = vrot.lane.b32.xlu0 %v57_v13, %s169_s17  ;;  %82 = vst [vmem:[#allocation0 + $0x2] sm:$0x1] %v78_v17 }
  0x19   :  { %88 = vst [vmem:[#allocation0 + $0x3] sm:$0x1] %v84_v18 }
  0x82   :  { %v41_v19 = vpop.permute.xlu0 %40  }
  0x83   :  { %44 = vst.msk [vmem:[#allocation2 + $0x48] sm:$0x1] %vm42_vm4, %v41_v19  }
  0x84   :  { %47 = vst.msk [vmem:[#allocation2 + $0x20] ss:$8 sm:$0xf] %vm45_vm5, %v41_v19  }
  0x85   :  { %49 = vst.msk [vmem:[#allocation2 + $0x3c] sm:$0x10] %vm45_vm5, %v41_v19  }
  0x8a   :  { %v120_v20 = vld [vmem:[#allocation2 + $0x48] sm:$0x1]  ;;  %v59_v21 = vpop.permute.xlu0 %58  }
  0x8b   :  { %v90_v22 = vld [vmem:[#allocation2 + $0x20] sm:$0x1]  ;;  %124 = vst [vmem:[#allocation0 + $0x9] sm:$0x1] %v120_v20 }
  0x8c   :  { %94 = vst [vmem:[#allocation0 + $0x4] sm:$0x1] %v90_v22 }
  0x8d   :  { %62 = vst.msk [vmem:[#allocation2 + $0x40] ss:$-24 sm:$0x3] %vm25_vm3, %v59_v21  }
  0x8e   :  { %64 = vst.msk [vmem:[#allocation2 + $0x20] ss:$8 sm:$0xc] %vm25_vm3, %v59_v21  }
  0x94   :  { %v96_v23 = vld [vmem:[#allocation2 + $0x28] sm:$0x1]  ;;  %v114_v24 = vld [vmem:[#allocation2 + $0x40] sm:$0x1] }
  0x95   :  { %100 = vst [vmem:[#allocation0 + $0x5] sm:$0x1] %v96_v23  ;;  %v102_v25 = vld [vmem:[#allocation2 + $0x30] sm:$0x1]  ;;  %v108_v26 = vld [vmem:[#allocation2 + $0x38] sm:$0x1] }
  0x96   :  { %106 = vst [vmem:[#allocation0 + $0x6] sm:$0x1] %v102_v25 }
  0x97   :  { %112 = vst [vmem:[#allocation0 + $0x7] sm:$0x1] %v108_v26 }
  0x98   :  { %118 = vst [vmem:[#allocation0 + $0x8] sm:$0x1] %v114_v24 }
  0x99   :  { %133 = dma.vmem_to_hbm [thread:$0]  %s129_s19, 160, %s131_s1, [#allocation1]  }
  0x9a   :  { %167 = dma.done.wait [#allocation1], 160  }
  0x9b   :  { %168 = vsyncadd [#allocation1], 4294967136 }
  0x9c   :  { %136 = vsyncpa [#allocation1], 1 }

// kernel: dgi_forward.4
= control target key start
LH: loop header
LB: loop body
LE: loop exit
PB: predicated region body
PF: predicated region fallthrough
CT: control target
= control target key end

     0   :  { %s1883_s17 = smov 0   ;;  %s1885_s18 = smov 0   ;;  %s2261_s0 = inlined_call_operand.vmem [shape: bf16[3,640,640], index: 0, kind: input, shape index: {}]   ;;  %s2262_s1 = inlined_call_operand.vmem [shape: bf16[2,640,128], index: 1, kind: input, shape index: {}]   ;;  %s2263_s2 = inlined_call_operand.vmem [shape: f32[1,128], index: 2, kind: input, shape index: {}]   ;;  %s2264_s3 = inlined_call_operand.<no memory space> [shape: f32[1,1], index: 3, kind: input, shape index: {}]   ;;  %s2265_s4 = inlined_call_operand.vmem [shape: f32[2,1,128], index: 4, kind: output, shape index: {}]  }
   0x1   :  { %9 = sst [smem:[#allocation3]] %s2264_s3  ;;  %s1887_s19 = smov 0  }
   0x2   :  { %s1889_s20 = smov 0   ;;  %s1891_s21 = smov 0  }
   0x3 LB: > { %s24_s3 = sadd.s32 1, %s1844_s19  ;;  %s27_s22 = sadd.s32 1, %s1848_s20  ;;  %s1852_s21 = sphi %s1891_s21, %s15_s21   ;;  %s1848_s20 = sphi %s1889_s20, %s2269_s20   ;;  %s1844_s19 = sphi %s1887_s19, %s2268_s19   ;;  %s1840_s18 = sphi %s1885_s18, %s2267_s18   ;;  %s1836_s17 = sphi %s1883_s17, %s2266_s17  }
   0x4   : > { %p25_p0 = scmp.ge.s32.totalorder %s24_s3, 5  ;;  %p1333_p1 = scmp.ge.s32.totalorder %s1852_s21, 1 }
   0x5   : > { %p187_p2 = scmp.lt.s32.totalorder %s1852_s21, 11 }
   0x6   : > { %s2271_s3 = smov (%p25_p0, %s24_s3), 0  ;;  %s2273_s22 = smov (!%p25_p0, %s27_s22), %s1848_s20 }
   0x7   : > { %p188_p3 = pnand %p1333_p1, %p187_p2  ;;  %p29_p4 = scmp.ge.s32.totalorder %s2273_s22, 2 }
   0x8   : > { %s217_s23 = sadd.s32 (!%p188_p3), 1, %s1840_s18  ;;  %s1334_s24 = sshll.u32 (!%p188_p3), %s1836_s17, 4 }
   0x9   : > { %s2275_s22 = smov (%p29_p4, %s2273_s22), 0  ;;  %191 = sbr.rel (%p188_p3) target bundleno = 405 (0x195), region = 36 }
   0xa   : > { %p219_p5 = scmp.lt.s32.totalorder (!%p188_p3), %s217_s23, 2  ;;  %p221_p6 = scmp.lt.s32.totalorder (!%p188_p3), %s1334_s24, 79 }
   0xb   : > { %p230_p7 = scmp.lt.s32.totalorder (!%p188_p3), %s1840_s18, 1  ;;  %p1336_p8 = scmp.ne.s32.totalorder (!%p188_p3), %s1836_s17, 0 }
   0xe   : > { %s2277_s23 = smov (!%p219_p5, %s217_s23), 2  ;;  %s2279_s24 = smov (!%p221_p6, %s1334_s24), 79 }
   0xf   : > { %s1767_s25 = smul.u32 400, %s2277_s23  ;;  %s2281_s18 = smov (!%p230_p7, %s1840_s18), 1 }
  0x10   : > { %s1766_s26 = smul.u32 5, %s2279_s24  ;;  %s232_s5 = scalar_lea.vmem %s2265_s4, %s2281_s18 }
  0x11   : > { %236 = sbr.rel (%p1336_p8) target bundleno = 24 (0x18), region = 40 }
  0x12   : > { %s225_s27 = sadd.s32 %s1767_s25, %s1766_s26 }
  0x13   : > { %s1335_s28 = sshll.u32 %s225_s27, 2 }
  0x14   : > { %s1925_s8 = scalar_lea.vmem %s2261_s0, %s1335_s28 }
  0x16   : > { %v1854_v0 = vmov 0.0  }
  0x17   : > { %237 = vst [vmem:[#allocation2] sm:$0x1] %v1854_v0 }
  0x18 PF: > { %v1709_v1 = vld [vmem:[%s2262_s1 + $0x38] sm:$0xff]  ;;  %v1708_v2 = vld [vmem:[%s2262_s1 + $0x30] sm:$0xff]  ;;  %v1707_v3 = vld [vmem:[%s2262_s1 + $0x28] sm:$0xff]  ;;  %s1063_s24 = sld [smem:[#allocation3]]  ;;  %s1657_s25 = sshll.u32 %s1836_s17, 7 }
  0x19   : > { %1742 = vmatpush.bf16.msra.mxu1 %v1709_v1  ;;  %1743 = vmatpush.bf16.msra.mxu2 %v1709_v1  ;;  %v1706_v4 = vld [vmem:[%s2262_s1 + $0x20] sm:$0xff]  ;;  %v1705_v5 = vld [vmem:[%s2262_s1 + $0x18] sm:$0xff]  ;;  %v1704_v6 = vld [vmem:[%s2262_s1 + $0x10] sm:$0xff]  ;;  %p1658_p9 = scmp.ne.s32.totalorder %s1836_s17, 4 }
  0x1a   : > { %1744 = vmatpush.bf16.msra.mxu3 %v1709_v1  ;;  %818 = vmatpush.bf16.msra.mxu0 %v1709_v1  ;;  %v1703_v7 = vld [vmem:[%s2262_s1 + $0x8] sm:$0xff]  ;;  %v1702_v8 = vld [vmem:[%s2262_s1] sm:$0xff]  ;;  %v1379_v9 = vld [vmem:[%s1925_s8 + $0x50] sm:$0xf] }
  0x1b   : > { %v1674_v10 = vld [vmem:[%s1925_s8 + $0x60] sm:$0xf0]  ;;  %v1419_v11 = vld [vmem:[%s1925_s8 + $0xa0] sm:$0xf]  ;;  %v1684_v12 = vld [vmem:[%s1925_s8 + $0xb0] sm:$0xf0] }
  0x1c   : > { %v1459_v13 = vld [vmem:[%s1925_s8 + $0xf0] sm:$0xf]  ;;  %v1694_v14 = vld [vmem:[%s1925_s8 + $0x100] sm:$0xf0]  ;;  %v1339_v15 = vld [vmem:[%s1925_s8] sm:$0xf]  ;;  %v1380_v19 = vor.u32 %v1674_v10, %v1379_v9  ;;  %v1420_v20 = vor.u32 %v1684_v12, %v1419_v11 }
  0x1d   : > { %1745 = vmatpush.bf16.msra.mxu1 %v1708_v2  ;;  %1746 = vmatpush.bf16.msra.mxu2 %v1708_v2  ;;  %v1664_v16 = vld [vmem:[%s1925_s8 + $0x10] sm:$0xf0]  ;;  %v1725_v17 = vld [vmem:[%s2262_s1 + $0xb8] sm:$0xff]  ;;  %v1460_v21 = vor.u32 %v1694_v14, %v1459_v13  ;;  %v1723_v29 = vld [vmem:[%s2262_s1 + $0xa8] sm:$0xff] }
  0x1e   : > { %1747 = vmatpush.bf16.msra.mxu3 %v1708_v2  ;;  %819 = vmatpush.bf16.msra.mxu0 %v1708_v2  ;;  %v1717_v18 = vld [vmem:[%s2262_s1 + $0x78] sm:$0xff]  ;;  %v1340_v22 = vor.u32 %v1664_v16, %v1339_v15  ;;  %v1724_v25 = vld [vmem:[%s2262_s1 + $0xb0] sm:$0xff]  ;;  %v1715_v30 = vld [vmem:[%s2262_s1 + $0x68] sm:$0xff] }
  0x1f   : > { %v1733_v23 = vld [vmem:[%s2262_s1 + $0xf8] sm:$0xff]  ;;  %v1716_v26 = vld [vmem:[%s2262_s1 + $0x70] sm:$0xff]  ;;  %v1731_v31 = vld [vmem:[%s2262_s1 + $0xe8] sm:$0xff] }
  0x20   : > { %v1741_v24 = vld [vmem:[%s2262_s1 + $0x138] sm:$0xff]  ;;  %v1732_v27 = vld [vmem:[%s2262_s1 + $0xf0] sm:$0xff]  ;;  %v1739_v32 = vld [vmem:[%s2262_s1 + $0x128] sm:$0xff] }
  0x21   : > { %1748 = vmatpush.bf16.msra.mxu1 %v1707_v3  ;;  %1749 = vmatpush.bf16.msra.mxu2 %v1707_v3  ;;  %v1740_v28 = vld [vmem:[%s2262_s1 + $0x130] sm:$0xff]  ;;  %v1722_v33 = vld [vmem:[%s2262_s1 + $0xa0] sm:$0xff]  ;;  %v1399_v37 = vld [vmem:[%s1925_s8 + $0x78] sm:$0xf] }
  0x22   : > { %1750 = vmatpush.bf16.msra.mxu3 %v1707_v3  ;;  %820 = vmatpush.bf16.msra.mxu0 %v1707_v3  ;;  %v1714_v34 = vld [vmem:[%s2262_s1 + $0x60] sm:$0xff]  ;;  %v1679_v38 = vld [vmem:[%s1925_s8 + $0x88] sm:$0xf0]  ;;  %v1439_v39 = vld [vmem:[%s1925_s8 + $0xc8] sm:$0xf] }
  0x23   : > { %v1730_v35 = vld [vmem:[%s2262_s1 + $0xe0] sm:$0xff]  ;;  %v1689_v40 = vld [vmem:[%s1925_s8 + $0xd8] sm:$0xf0]  ;;  %v1479_v41 = vld [vmem:[%s1925_s8 + $0x118] sm:$0xf]  ;;  %v1400_v47 = vor.u32 %v1679_v38, %v1399_v37 }
  0x24   : > { %v1738_v36 = vld [vmem:[%s2262_s1 + $0x120] sm:$0xff]  ;;  %v1699_v42 = vld [vmem:[%s1925_s8 + $0x128] sm:$0xf0]  ;;  %v1359_v43 = vld [vmem:[%s1925_s8 + $0x28] sm:$0xf]  ;;  %v1440_v48 = vor.u32 %v1689_v40, %v1439_v39 }
  0x25   : > { %1751 = vmatpush.bf16.msra.mxu1 %v1706_v4  ;;  %1752 = vmatpush.bf16.msra.mxu2 %v1706_v4  ;;  %v1669_v44 = vld [vmem:[%s1925_s8 + $0x38] sm:$0xf0]  ;;  %v1480_v49 = vor.u32 %v1699_v42, %v1479_v41  ;;  %v1720_v53 = vld [vmem:[%s2262_s1 + $0x90] sm:$0xff]  ;;  %v1719_v57 = vld [vmem:[%s2262_s1 + $0x88] sm:$0xff] }
  0x26   : > { %1753 = vmatpush.bf16.msra.mxu3 %v1706_v4  ;;  %821 = vmatpush.bf16.msra.mxu0 %v1706_v4  ;;  %v1721_v45 = vld [vmem:[%s2262_s1 + $0x98] sm:$0xff]  ;;  %v1360_v50 = vor.u32 %v1669_v44, %v1359_v43  ;;  %v1712_v54 = vld [vmem:[%s2262_s1 + $0x50] sm:$0xff]  ;;  %v1711_v58 = vld [vmem:[%s2262_s1 + $0x48] sm:$0xff] }
  0x27   : > { %v1713_v46 = vld [vmem:[%s2262_s1 + $0x58] sm:$0xff]  ;;  %v1728_v55 = vld [vmem:[%s2262_s1 + $0xd0] sm:$0xff]  ;;  %v1727_v59 = vld [vmem:[%s2262_s1 + $0xc8] sm:$0xff] }
  0x28   : > { %v1729_v51 = vld [vmem:[%s2262_s1 + $0xd8] sm:$0xff]  ;;  %v1736_v56 = vld [vmem:[%s2262_s1 + $0x110] sm:$0xff]  ;;  %v1735_v60 = vld [vmem:[%s2262_s1 + $0x108] sm:$0xff] }
  0x29   : > { %1754 = vmatpush.bf16.msra.mxu1 %v1705_v5  ;;  %1755 = vmatpush.bf16.msra.mxu2 %v1705_v5  ;;  %v1737_v52 = vld [vmem:[%s2262_s1 + $0x118] sm:$0xff]  ;;  %v1718_v61 = vld [vmem:[%s2262_s1 + $0x80] sm:$0xff]  ;;  %v1347_v3 = vld [vmem:[%s1925_s8 + $0x8] sm:$0xf] }
  0x2a   : > { %1756 = vmatpush.bf16.msra.mxu3 %v1705_v5  ;;  %822 = vmatpush.bf16.msra.mxu0 %v1705_v5  ;;  %v1710_v62 = vld [vmem:[%s2262_s1 + $0x40] sm:$0xff]  ;;  %v1341_v2 = vld [vmem:[%s1925_s8 + $0x14] sm:$0xf0]  ;;  %v1665_v4 = vld [vmem:[%s1925_s8 + $0x18] sm:$0xf0] }
  0x2b   : > { %v1726_v63 = vld [vmem:[%s2262_s1 + $0xc0] sm:$0xff]  ;;  %v1663_v5 = vld [vmem:[%s1925_s8 + $0xc] sm:$0xf]  ;;  %v1348_v10 = vor.u32 %v1665_v4, %v1347_v3  ;;  %v1367_v15 = vld [vmem:[%s1925_s8 + $0x30] sm:$0xf] }
  0x2c   : > { %v1734_v0 = vld [vmem:[%s2262_s1 + $0x100] sm:$0xff]  ;;  %v1667_v13 = vld [vmem:[%s1925_s8 + $0x2c] sm:$0xf]  ;;  %v1677_v37 = vld [vmem:[%s1925_s8 + $0x7c] sm:$0xf] }
  0x2d   : > { %1757 = vmatpush.bf16.msra.mxu1 %v1704_v6  ;;  %1758 = vmatpush.bf16.msra.mxu2 %v1704_v6  ;;  %v1662_v1 = vld [vmem:[%s1925_s8 + $0x4] sm:$0xf]  ;;  %v1361_v14 = vld [vmem:[%s1925_s8 + $0x3c] sm:$0xf0]  ;;  %v1401_v38 = vld [vmem:[%s1925_s8 + $0x8c] sm:$0xf0] }
  0x2e   : > { %1759 = vmatpush.bf16.msra.mxu3 %v1704_v6  ;;  %823 = vmatpush.bf16.msra.mxu0 %v1704_v6  ;;  %v1349_v6 = vld [vmem:[%s1925_s8 + $0x1c] sm:$0xf0]  ;;  %v1344_v9 = vor.u32 %v1662_v1, %v1341_v2  ;;  %v1670_v16 = vld [vmem:[%s1925_s8 + $0x40] sm:$0xf0]  ;;  %v1680_v40 = vld [vmem:[%s1925_s8 + $0x90] sm:$0xf0] }
  0x2f   : > { %v1352_v11 = vor.u32 %v1663_v5, %v1349_v6  ;;  %v1407_v39 = vld [vmem:[%s1925_s8 + $0x80] sm:$0xf]  ;;  %v1678_v41 = vld [vmem:[%s1925_s8 + $0x84] sm:$0xf]  ;;  %v1409_v42 = vld [vmem:[%s1925_s8 + $0x94] sm:$0xf0] }
  0x30   : > { %v1415_v43 = vld [vmem:[%s1925_s8 + $0x88] sm:$0xf]  ;;  %v1681_v44 = vld [vmem:[%s1925_s8 + $0x98] sm:$0xf0]  ;;  %v1688_v1 = vld [vmem:[%s1925_s8 + $0xd4] sm:$0xf] }
  0x31   : > { %1760 = vmatpush.bf16.msra.mxu1 %v1703_v7  ;;  %1761 = vmatpush.bf16.msra.mxu2 %v1703_v7  ;;  %v1449_v2 = vld [vmem:[%s1925_s8 + $0xe4] sm:$0xf0]  ;;  %v1455_v3 = vld [vmem:[%s1925_s8 + $0xd8] sm:$0xf]  ;;  %v1691_v4 = vld [vmem:[%s1925_s8 + $0xe8] sm:$0xf0] }
  0x32   : > { %1762 = vmatpush.bf16.msra.mxu3 %v1703_v7  ;;  %824 = vmatpush.bf16.msra.mxu0 %v1703_v7  ;;  %v1355_v7 = vld [vmem:[%s1925_s8 + $0x10] sm:$0xf] }
  0x35   : > { %1763 = vmatpush.bf16.msra.mxu1 %v1702_v8  ;;  %1764 = vmatpush.bf16.msra.mxu2 %v1702_v8 }
  0x36   : > { %1765 = vmatpush.bf16.msra.mxu3 %v1702_v8  ;;  %825 = vmatpush.bf16.msra.mxu0 %v1702_v8  ;;  %v1666_v8 = vld [vmem:[%s1925_s8 + $0x20] sm:$0xf0] }
  0x37   : > { %v1356_v12 = vor.u32 %v1666_v8, %v1355_v7  ;;  %v1452_v7 = vor.u32 %v1688_v1, %v1449_v2  ;;  %v1456_v8 = vor.u32 %v1691_v4, %v1455_v3  ;;  %v2163_v2 = vstv %s1657_s25 }
  0x38   : > { %836 = vmatmul.bf16.vlgmr.msra.gmra.mxu1 %v1380_v19  ;;  %846 = vmatmul.bf16.vlgmr.msra.gmra.mxu2 %v1420_v20  ;;  %v1375_v19 = vld [vmem:[%s1925_s8 + $0x38] sm:$0xf]  ;;  %v1671_v20 = vld [vmem:[%s1925_s8 + $0x48] sm:$0xf0]  ;;  %v2165_v3 = vstv %s1063_s24 }
  0x39   : > { %916 = vmatpush.bf16.msrb.mxu2 %v1725_v17  ;;  %867 = vmatpush.bf16.msrb.mxu1 %v1717_v18  ;;  %v1668_v17 = vld [vmem:[%s1925_s8 + $0x34] sm:$0xf]  ;;  %v1369_v18 = vld [vmem:[%s1925_s8 + $0x44] sm:$0xf0] }
  0x3a   : > { %856 = vmatmul.bf16.vlgmr.msra.gmra.mxu3 %v1460_v21  ;;  %826 = vmatmul.bf16.vlgmr.msra.gmra.mxu0 %v1340_v22  ;;  %v1364_v21 = vor.u32 %v1667_v13, %v1361_v14  ;;  %v1368_v22 = vor.u32 %v1670_v16, %v1367_v15  ;;  %v1693_v13 = vld [vmem:[%s1925_s8 + $0xfc] sm:$0xf]  ;;  %v1469_v14 = vld [vmem:[%s1925_s8 + $0x10c] sm:$0xf0]  ;;  %v1475_v15 = vld [vmem:[%s1925_s8 + $0x100] sm:$0xf] }
  0x3b   : > { %965 = vmatpush.bf16.msrb.mxu3 %v1733_v23  ;;  %1014 = vmatpush.bf16.msrb.mxu0 %v1741_v24  ;;  %v1372_v23 = vor.u32 %v1668_v17, %v1369_v18  ;;  %v1376_v24 = vor.u32 %v1671_v20, %v1375_v19  ;;  %v1696_v16 = vld [vmem:[%s1925_s8 + $0x110] sm:$0xf0]  ;;  %v1472_v20 = vor.u32 %v1693_v13, %v1469_v14 }
  0x3d   : > { %917 = vmatpush.bf16.msrb.mxu2 %v1724_v25  ;;  %868 = vmatpush.bf16.msrb.mxu1 %v1716_v26  ;;  %v1672_v25 = vld [vmem:[%s1925_s8 + $0x54] sm:$0xf]  ;;  %v1381_v26 = vld [vmem:[%s1925_s8 + $0x64] sm:$0xf0] }
  0x3f   : > { %966 = vmatpush.bf16.msrb.mxu3 %v1732_v27  ;;  %1015 = vmatpush.bf16.msrb.mxu0 %v1740_v28  ;;  %v1387_v27 = vld [vmem:[%s1925_s8 + $0x58] sm:$0xf]  ;;  %v1675_v28 = vld [vmem:[%s1925_s8 + $0x68] sm:$0xf0] }
  0x41   : > { %918 = vmatpush.bf16.msrb.mxu2 %v1723_v29  ;;  %869 = vmatpush.bf16.msrb.mxu1 %v1715_v30  ;;  %v1673_v29 = vld [vmem:[%s1925_s8 + $0x5c] sm:$0xf]  ;;  %v1389_v30 = vld [vmem:[%s1925_s8 + $0x6c] sm:$0xf0] }
  0x43   : > { %967 = vmatpush.bf16.msrb.mxu3 %v1731_v31  ;;  %1016 = vmatpush.bf16.msrb.mxu0 %v1739_v32  ;;  %v1395_v31 = vld [vmem:[%s1925_s8 + $0x60] sm:$0xf]  ;;  %v1676_v32 = vld [vmem:[%s1925_s8 + $0x70] sm:$0xf0] }
  0x45   : > { %919 = vmatpush.bf16.msrb.mxu2 %v1722_v33  ;;  %870 = vmatpush.bf16.msrb.mxu1 %v1714_v34  ;;  %v1384_v33 = vor.u32 %v1672_v25, %v1381_v26  ;;  %v1388_v34 = vor.u32 %v1675_v28, %v1387_v27  ;;  %v1697_v27 = vld [vmem:[%s1925_s8 + $0x11c] sm:$0xf]  ;;  %v1481_v28 = vld [vmem:[%s1925_s8 + $0x12c] sm:$0xf0] }
  0x47   : > { %968 = vmatpush.bf16.msrb.mxu3 %v1730_v35  ;;  %1017 = vmatpush.bf16.msrb.mxu0 %v1738_v36  ;;  %v1392_v35 = vor.u32 %v1673_v29, %v1389_v30  ;;  %v1396_v36 = vor.u32 %v1676_v32, %v1395_v31  ;;  %v1487_v29 = vld [vmem:[%s1925_s8 + $0x120] sm:$0xf]  ;;  %v1700_v30 = vld [vmem:[%s1925_s8 + $0x130] sm:$0xf0]  ;;  %v1698_v31 = vld [vmem:[%s1925_s8 + $0x124] sm:$0xf] }
  0x48   : > { %841 = vmatmul.bf16.gmra.mxu1 %v1400_v47  ;;  %851 = vmatmul.bf16.gmra.mxu2 %v1440_v48  ;;  %v1412_v47 = vor.u32 %v1678_v41, %v1409_v42  ;;  %v1416_v48 = vor.u32 %v1681_v44, %v1415_v43  ;;  %v1489_v32 = vld [vmem:[%s1925_s8 + $0x134] sm:$0xf0] }
  0x49   : > { %920 = vmatpush.bf16.msrb.mxu2 %v1721_v45  ;;  %871 = vmatpush.bf16.msrb.mxu1 %v1713_v46  ;;  %v1404_v45 = vor.u32 %v1677_v37, %v1401_v38  ;;  %v1408_v46 = vor.u32 %v1680_v40, %v1407_v39  ;;  %v1484_v37 = vor.u32 %v1697_v27, %v1481_v28 }
  0x4a   : > { %861 = vmatmul.bf16.gmra.mxu3 %v1480_v49  ;;  %831 = vmatmul.bf16.gmra.mxu0 %v1360_v50  ;;  %v1682_v49 = vld [vmem:[%s1925_s8 + $0xa4] sm:$0xf]  ;;  %v1421_v50 = vld [vmem:[%s1925_s8 + $0xb4] sm:$0xf0]  ;;  %v1488_v38 = vor.u32 %v1700_v30, %v1487_v29  ;;  %v1492_v40 = vor.u32 %v1698_v31, %v1489_v32 }
  0x4b   : > { %969 = vmatpush.bf16.msrb.mxu3 %v1729_v51  ;;  %1018 = vmatpush.bf16.msrb.mxu0 %v1737_v52  ;;  %v1427_v51 = vld [vmem:[%s1925_s8 + $0xa8] sm:$0xf]  ;;  %v1685_v52 = vld [vmem:[%s1925_s8 + $0xb8] sm:$0xf0] }
  0x4d   : > { %921 = vmatpush.bf16.msrb.mxu2 %v1720_v53  ;;  %872 = vmatpush.bf16.msrb.mxu1 %v1712_v54  ;;  %v1683_v53 = vld [vmem:[%s1925_s8 + $0xac] sm:$0xf]  ;;  %v1429_v54 = vld [vmem:[%s1925_s8 + $0xbc] sm:$0xf0] }
  0x4f   : > { %970 = vmatpush.bf16.msrb.mxu3 %v1728_v55  ;;  %1019 = vmatpush.bf16.msrb.mxu0 %v1736_v56  ;;  %v1435_v55 = vld [vmem:[%s1925_s8 + $0xb0] sm:$0xf]  ;;  %v1686_v56 = vld [vmem:[%s1925_s8 + $0xc0] sm:$0xf0] }
  0x51   : > { %922 = vmatpush.bf16.msrb.mxu2 %v1719_v57  ;;  %873 = vmatpush.bf16.msrb.mxu1 %v1711_v58  ;;  %v1424_v57 = vor.u32 %v1682_v49, %v1421_v50  ;;  %v1428_v58 = vor.u32 %v1685_v52, %v1427_v51 }
  0x53   : > { %971 = vmatpush.bf16.msrb.mxu3 %v1727_v59  ;;  %1020 = vmatpush.bf16.msrb.mxu0 %v1735_v60  ;;  %v1432_v59 = vor.u32 %v1683_v53, %v1429_v54  ;;  %v1436_v60 = vor.u32 %v1686_v56, %v1435_v55  ;;  %v1113_v55 = vlaneseq }
  0x55   : > { %923 = vmatpush.bf16.msrb.mxu2 %v1718_v61  ;;  %874 = vmatpush.bf16.msrb.mxu1 %v1710_v62  ;;  %v1687_v61 = vld [vmem:[%s1925_s8 + $0xcc] sm:$0xf]  ;;  %v1441_v62 = vld [vmem:[%s1925_s8 + $0xdc] sm:$0xf0] }
  0x56   : > { %v1444_v5 = vor.u32 %v1687_v61, %v1441_v62 }
  0x57   : > { %972 = vmatpush.bf16.msrb.mxu3 %v1726_v63  ;;  %1021 = vmatpush.bf16.msrb.mxu0 %v1734_v0  ;;  %v1447_v63 = vld [vmem:[%s1925_s8 + $0xd0] sm:$0xf]  ;;  %v1690_v0 = vld [vmem:[%s1925_s8 + $0xe0] sm:$0xf0] }
  0x58   : > { %875 = vmatmul.bf16.vlgmr.msrb.gmra.mxu1 %v1344_v9  ;;  %924 = vmatmul.bf16.vlgmr.msrb.gmra.mxu2 %v1348_v10  ;;  %v1448_v6 = vor.u32 %v1690_v0, %v1447_v63  ;;  %v1692_v9 = vld [vmem:[%s1925_s8 + $0xf4] sm:$0xf]  ;;  %v1461_v10 = vld [vmem:[%s1925_s8 + $0x104] sm:$0xf0]  ;;  %v2159_v63 = vshrl.u32 %v1113_v55, 7 }
  0x59   : > { %v1464_v17 = vor.u32 %v1692_v9, %v1461_v10 }
  0x5a   : > { %973 = vmatmul.bf16.vlgmr.msrb.gmra.mxu3 %v1352_v11  ;;  %1022 = vmatmul.bf16.vlgmr.msrb.gmra.mxu0 %v1356_v12  ;;  %v1467_v11 = vld [vmem:[%s1925_s8 + $0xf8] sm:$0xf]  ;;  %v1695_v12 = vld [vmem:[%s1925_s8 + $0x108] sm:$0xf0]  ;;  %v1115_v1 = vadd.s32 8, %v2159_v63 }
  0x5b   : > { %v1468_v18 = vor.u32 %v1695_v12, %v1467_v11 }
  0x5c   : > { %v1133_v9 = vadd.s32 %v2163_v2, %v1115_v1 }
  0x5e   : > { %vm1149_vm2 = vcmp.lt.s32.totalorder %v1133_v9, 600 }
  0x68   : > { %880 = vmatmul.bf16.gmra.mxu1 %v1364_v21  ;;  %929 = vmatmul.bf16.gmra.mxu2 %v1368_v22  ;;  %v1476_v21 = vor.u32 %v1696_v16, %v1475_v15 }
  0x6a   : > { %978 = vmatmul.bf16.gmra.mxu3 %v1372_v23  ;;  %1027 = vmatmul.bf16.gmra.mxu0 %v1376_v24 }
  0x78   : > { %885 = vmatmul.bf16.gmra.mxu1 %v1384_v33  ;;  %934 = vmatmul.bf16.gmra.mxu2 %v1388_v34  ;;  %v1495_v33 = vld [vmem:[%s1925_s8 + $0x128] sm:$0xf]  ;;  %v1701_v34 = vld [vmem:[%s1925_s8 + $0x138] sm:$0xf0] }
  0x79   : > { %v1496_v41 = vor.u32 %v1701_v34, %v1495_v33 }
  0x7a   : > { %983 = vmatmul.bf16.gmra.mxu3 %v1392_v35  ;;  %1032 = vmatmul.bf16.gmra.mxu0 %v1396_v36 }
  0x88   : > { %890 = vmatmul.bf16.gmra.mxu1 %v1404_v45  ;;  %939 = vmatmul.bf16.gmra.mxu2 %v1408_v46 }
  0x8a   : > { %988 = vmatmul.bf16.gmra.mxu3 %v1412_v47  ;;  %1037 = vmatmul.bf16.gmra.mxu0 %v1416_v48  ;;  %v2151_v47 = vld [vmem:[%s2263_s2] ss:$0 sm:$0xff] }
  0x98   : > { %895 = vmatmul.bf16.gmra.mxu1 %v1424_v57  ;;  %944 = vmatmul.bf16.gmra.mxu2 %v1428_v58 }
  0x9a   : > { %993 = vmatmul.bf16.gmra.mxu3 %v1432_v59  ;;  %1042 = vmatmul.bf16.gmra.mxu0 %v1436_v60 }
  0xa8   : > { %900 = vmatmul.bf16.gmra.mxu1 %v1444_v5  ;;  %949 = vmatmul.bf16.gmra.mxu2 %v1448_v6 }
  0xaa   : > { %998 = vmatmul.bf16.gmra.mxu3 %v1452_v7  ;;  %1047 = vmatmul.bf16.gmra.mxu0 %v1456_v8  ;;  %v1132_v8 = vadd.s32 %v2163_v2, %v2159_v63 }
  0xac   : > { %vm1148_vm1 = vcmp.lt.s32.totalorder %v1132_v8, 600 }
  0xb5   : > { %v2120_v19 = vpop.f32.mrf.mxu1 }
  0xb7   : > { %v827_v22 = vpop.f32.mrf.mxu0 }
  0xb8   : > { %905 = vmatmul.bf16.gmra.mxu1 %v1464_v17  ;;  %954 = vmatmul.bf16.gmra.mxu2 %v1468_v18  ;;  %v828_v49 = vadd.f32 %v2151_v47, %v827_v22  ;;  %v1116_v18 = vadd.s32 16, %v2159_v63 }
  0xba   : > { %1003 = vmatmul.bf16.gmra.mxu3 %v1472_v20  ;;  %1052 = vmatmul.bf16.gmra.mxu0 %v1476_v21  ;;  %v1134_v33 = vadd.s32 %v2163_v2, %v1116_v18 }
  0xbb   : > { %v2122_v23 = vpop.f32.mrf.mxu2 }
  0xbc   : > { %vm1150_vm5 = vcmp.lt.s32.totalorder %v1134_v33, 600 }
  0xbd   : > { %v2124_v24 = vpop.f32.mrf.mxu3  ;;  %v2126_v25 = vpop.f32.mrf.mxu1 }
  0xbf   : > { %v829_v26 = vpop.f32.mrf.mxu0 }
  0xc0   : > { %v830_v56 = vadd.f32 %v2151_v47, %v829_v26 }
  0xc3   : > { %v2136_v35 = vpop.f32.mrf.mxu2 }
  0xc5   : > { %v2138_v36 = vpop.f32.mrf.mxu3  ;;  %v2140_v39 = vpop.f32.mrf.mxu1 }
  0xc7   : > { %v832_v42 = vpop.f32.mrf.mxu0 }
  0xc8   : > { %910 = vmatmul.bf16.gmra.mxu1 %v1484_v37  ;;  %959 = vmatmul.bf16.gmra.mxu2 %v1488_v38  ;;  %v833_v5 = vadd.f32 %v2151_v47, %v832_v42 }
  0xca   : > { %1008 = vmatmul.bf16.gmra.mxu3 %v1492_v40  ;;  %1057 = vmatmul.bf16.gmra.mxu0 %v1496_v41  ;;  %v1117_v41 = vadd.s32 24, %v2159_v63 }
  0xcb   : > { %v2142_v43 = vpop.f32.mrf.mxu2 }
  0xcd   : > { %v2144_v44 = vpop.f32.mrf.mxu3  ;;  %v2146_v45 = vpop.f32.mrf.mxu1 }
  0xcf   : > { %v834_v46 = vpop.f32.mrf.mxu0 }
  0xd0   : > { %v835_v21 = vadd.f32 %v2151_v47, %v834_v46  ;;  %v838_v46 = vadd.f32 %v2151_v47, %v2120_v19 }
  0xd3   : > { %v2153_v48 = vpop.f32.mrf.mxu2 }
  0xd5   : > { %v2156_v50 = vpop.f32.mrf.mxu3  ;;  %v876_v51 = vpop.f32.mrf.mxu1 }
  0xd6   : > { %v877_v52 = vadd.f32 %v876_v51, %v828_v49 }
  0xd7   : > { %v1023_v53 = vpop.f32.mrf.mxu0 }
  0xdb   : > { %v925_v54 = vpop.f32.mrf.mxu2 }
  0xdc   : > { %v926_v57 = vadd.f32 %v925_v54, %v877_v52 }
  0xdd   : > { %v974_v58 = vpop.f32.mrf.mxu3  ;;  %v878_v59 = vpop.f32.mrf.mxu1 }
  0xde   : > { %v975_v60 = vadd.f32 %v974_v58, %v926_v57  ;;  %v879_v61 = vadd.f32 %v878_v59, %v830_v56  ;;  %v1135_v57 = vadd.s32 %v2163_v2, %v1117_v41 }
  0xdf   : > { %v1025_v62 = vpop.f32.mrf.mxu0 }
  0xe0   : > { %v1024_v0 = vadd.f32 %v1023_v53, %v975_v60  ;;  %vm1151_vm7 = vcmp.lt.s32.totalorder %v1135_v57, 600 }
  0xe2   : > { %v1081_v11 = vmul.f32 %v2165_v3, %v1024_v0  ;;  %vm1064_vm0 = vcmp.gt.f32.partialorder %v1024_v0, 0.0 }
  0xe3   : > { %v927_v4 = vpop.f32.mrf.mxu2 }
  0xe4   : > { %v928_v6 = vadd.f32 %v927_v4, %v879_v61  ;;  %v1097_v16 = vsel %vm1064_vm0, %v1024_v0, %v1081_v11  ;;  %v1118_v61 = vadd.s32 32, %v2159_v63  ;;  %v840_v11 = vadd.f32 %v2151_v47, %v2126_v25 }
  0xe5   : > { %v976_v7 = vpop.f32.mrf.mxu3  ;;  %v881_v10 = vpop.f32.mrf.mxu1  ;;  %v1196_v28 = vsel %vm1148_vm1, %v1097_v16, 0.0  ;;  %v843_v25 = vadd.f32 %v2151_v47, %v2140_v39  ;;  %v845_v39 = vadd.f32 %v2151_v47, %v2146_v45  ;;  %v848_v45 = vadd.f32 %v2151_v47, %v2122_v23 }
  0xe6   : > { %v977_v12 = vadd.f32 %v976_v7, %v928_v6  ;;  %v882_v13 = vadd.f32 %v881_v10, %v833_v5  ;;  %v1136_v6 = vadd.s32 %v2163_v2, %v1118_v61  ;;  %v850_v23 = vadd.f32 %v2151_v47, %v2136_v35 }
  0xe7   : > { %v1028_v14 = vpop.f32.mrf.mxu0  ;;  %v853_v35 = vadd.f32 %v2151_v47, %v2142_v43  ;;  %v855_v43 = vadd.f32 %v2151_v47, %v2153_v48  ;;  %v858_v48 = vadd.f32 %v2151_v47, %v2124_v24  ;;  %v860_v24 = vadd.f32 %v2151_v47, %v2138_v36 }
  0xe8   : > { %v1026_v15 = vadd.f32 %v1025_v62, %v977_v12  ;;  %vm1152_vm8 = vcmp.lt.s32.totalorder %v1136_v6, 600  ;;  %v1122_v6 = vadd.s32 64, %v2159_v63  ;;  %v863_v36 = vadd.f32 %v2151_v47, %v2144_v44 }
  0xe9   : > { %v865_v44 = vadd.f32 %v2151_v47, %v2156_v50 }
  0xea   : > { %vm1065_vm3 = vcmp.gt.f32.partialorder %v1026_v15, 0.0  ;;  %v1082_v17 = vmul.f32 %v2165_v3, %v1026_v15 }
  0xeb   : > { %v930_v20 = vpop.f32.mrf.mxu2 }
  0xec   : > { %v1098_v22 = vsel %vm1065_vm3, %v1026_v15, %v1082_v17  ;;  %v931_v26 = vadd.f32 %v930_v20, %v882_v13  ;;  %v1119_v15 = vadd.s32 40, %v2159_v63 }
  0xed   : > { %v979_v27 = vpop.f32.mrf.mxu3  ;;  %v1197_v29 = vsel %vm1149_vm2, %v1098_v22, 0.0  ;;  %v883_v30 = vpop.f32.mrf.mxu1 }
  0xee   : > { %v1213_v31 = vadd.f32 %v1197_v29, %v1196_v28  ;;  %v980_v32 = vadd.f32 %v979_v27, %v931_v26  ;;  %v884_v34 = vadd.f32 %v883_v30, %v835_v21  ;;  %v1137_v28 = vadd.s32 %v2163_v2, %v1119_v15 }
  0xef   : > { %v1030_v37 = vpop.f32.mrf.mxu0 }
  0xf0   : > { %v1029_v38 = vadd.f32 %v1028_v14, %v980_v32  ;;  %vm1153_vm11 = vcmp.lt.s32.totalorder %v1137_v28, 600 }
  0xf2   : > { %vm1066_vm4 = vcmp.gt.f32.partialorder %v1029_v38, 0.0  ;;  %v1083_v40 = vmul.f32 %v2165_v3, %v1029_v38 }
  0xf3   : > { %v932_v42 = vpop.f32.mrf.mxu2 }
  0xf4   : > { %v1099_v49 = vsel %vm1066_vm4, %v1029_v38, %v1083_v40  ;;  %v933_v51 = vadd.f32 %v932_v42, %v884_v34 }
  0xf5   : > { %v981_v52 = vpop.f32.mrf.mxu3  ;;  %v1198_v53 = vsel %vm1150_vm5, %v1099_v49, 0.0  ;;  %v886_v54 = vpop.f32.mrf.mxu1 }
  0xf6   : > { %v1214_v55 = vadd.f32 %v1213_v31, %v1198_v53  ;;  %v982_v56 = vadd.f32 %v981_v52, %v933_v51  ;;  %v887_v58 = vadd.f32 %v886_v54, %v838_v46  ;;  %v1120_v31 = vadd.s32 48, %v2159_v63 }
  0xf7   : > { %v1033_v59 = vpop.f32.mrf.mxu0 }
  0xf8   : > { %v1031_v60 = vadd.f32 %v1030_v37, %v982_v56  ;;  %v1138_v42 = vadd.s32 %v2163_v2, %v1120_v31  ;;  %v1121_v56 = vadd.s32 56, %v2159_v63 }
  0xfa   : > { %vm1067_vm6 = vcmp.gt.f32.partialorder %v1031_v60, 0.0  ;;  %v1084_v62 = vmul.f32 %v2165_v3, %v1031_v60  ;;  %vm1154_vm12 = vcmp.lt.s32.totalorder %v1138_v42, 600 }
  0xfb   : > { %v935_v0 = vpop.f32.mrf.mxu2 }
  0xfc   : > { %v1100_v19 = vsel %vm1067_vm6, %v1031_v60, %v1084_v62  ;;  %v936_v1 = vadd.f32 %v935_v0, %v887_v58 }
  0xfd   : > { %v984_v4 = vpop.f32.mrf.mxu3  ;;  %v1199_v5 = vsel %vm1151_vm7, %v1100_v19, 0.0  ;;  %v888_v7 = vpop.f32.mrf.mxu1 }
  0xfe   : > { %v1215_v8 = vadd.f32 %v1214_v55, %v1199_v5  ;;  %v985_v9 = vadd.f32 %v984_v4, %v936_v1  ;;  %v889_v14 = vadd.f32 %v888_v7, %v840_v11  ;;  %v1139_v1 = vadd.s32 %v2163_v2, %v1121_v56 }
  0xff   : > { %v1035_v10 = vpop.f32.mrf.mxu0 }
 0x100   : > { %v1034_v12 = vadd.f32 %v1033_v59, %v985_v9  ;;  %vm1155_vm15 = vcmp.lt.s32.totalorder %v1139_v1, 600 }
 0x102   : > { %vm1068_vm9 = vcmp.gt.f32.partialorder %v1034_v12, 0.0  ;;  %v1085_v13 = vmul.f32 %v2165_v3, %v1034_v12 }
 0x103   : > { %v937_v16 = vpop.f32.mrf.mxu2 }
 0x104   : > { %v1101_v17 = vsel %vm1068_vm9, %v1034_v12, %v1085_v13  ;;  %v938_v18 = vadd.f32 %v937_v16, %v889_v14  ;;  %v1140_v14 = vadd.s32 %v2163_v2, %v1122_v6 }
 0x105   : > { %v986_v20 = vpop.f32.mrf.mxu3  ;;  %v1200_v21 = vsel %vm1152_vm8, %v1101_v17, 0.0  ;;  %v891_v22 = vpop.f32.mrf.mxu1 }
 0x106   : > { %v1216_v26 = vadd.f32 %v1215_v8, %v1200_v21  ;;  %v987_v27 = vadd.f32 %v986_v20, %v938_v18  ;;  %v892_v33 = vadd.f32 %v891_v22, %v843_v25  ;;  %vm1156_vm0 = vcmp.lt.s32.totalorder %v1140_v14, 600 }
 0x107   : > { %v1038_v29 = vpop.f32.mrf.mxu0 }
 0x108   : > { %v1036_v30 = vadd.f32 %v1035_v10, %v987_v27 }
 0x10a   : > { %vm1069_vm10 = vcmp.gt.f32.partialorder %v1036_v30, 0.0  ;;  %v1086_v32 = vmul.f32 %v2165_v3, %v1036_v30 }
 0x10b   : > { %v940_v34 = vpop.f32.mrf.mxu2 }
 0x10c   : > { %v1102_v37 = vsel %vm1069_vm10, %v1036_v30, %v1086_v32  ;;  %v941_v38 = vadd.f32 %v940_v34, %v892_v33 }
 0x10d   : > { %v989_v40 = vpop.f32.mrf.mxu3  ;;  %v1201_v41 = vsel %vm1153_vm11, %v1102_v37, 0.0  ;;  %v893_v46 = vpop.f32.mrf.mxu1 }
 0x10e   : > { %v1217_v49 = vadd.f32 %v1216_v26, %v1201_v41  ;;  %v990_v51 = vadd.f32 %v989_v40, %v941_v38  ;;  %v894_v55 = vadd.f32 %v893_v46, %v845_v39  ;;  %v1123_v26 = vadd.s32 72, %v2159_v63 }
 0x10f   : > { %v1040_v52 = vpop.f32.mrf.mxu0  ;;  %v1124_v40 = vadd.s32 80, %v2159_v63 }
 0x110   : > { %v1039_v53 = vadd.f32 %v1038_v29, %v990_v51  ;;  %v1141_v34 = vadd.s32 %v2163_v2, %v1123_v26 }
 0x112   : > { %vm1070_vm13 = vcmp.gt.f32.partialorder %v1039_v53, 0.0  ;;  %v1087_v54 = vmul.f32 %v2165_v3, %v1039_v53  ;;  %vm1157_vm3 = vcmp.lt.s32.totalorder %v1141_v34, 600 }
 0x113   : > { %v942_v57 = vpop.f32.mrf.mxu2 }
 0x114   : > { %v1103_v58 = vsel %vm1070_vm13, %v1039_v53, %v1087_v54  ;;  %v943_v59 = vadd.f32 %v942_v57, %v894_v55  ;;  %v1142_v53 = vadd.s32 %v2163_v2, %v1124_v40 }
 0x115   : > { %v991_v60 = vpop.f32.mrf.mxu3  ;;  %v1202_v61 = vsel %vm1154_vm12, %v1103_v58, 0.0  ;;  %v896_v62 = vpop.f32.mrf.mxu1 }
 0x116   : > { %v1218_v0 = vadd.f32 %v1217_v49, %v1202_v61  ;;  %v992_v19 = vadd.f32 %v991_v60, %v943_v59  ;;  %v897_v8 = vadd.f32 %v896_v62, %v848_v45  ;;  %vm1158_vm4 = vcmp.lt.s32.totalorder %v1142_v53, 600 }
 0x117   : > { %v1043_v4 = vpop.f32.mrf.mxu0  ;;  %v1125_v61 = vadd.s32 88, %v2159_v63 }
 0x118   : > { %v1041_v5 = vadd.f32 %v1040_v52, %v992_v19 }
 0x11a   : > { %vm1071_vm14 = vcmp.gt.f32.partialorder %v1041_v5, 0.0  ;;  %v1088_v7 = vmul.f32 %v2165_v3, %v1041_v5 }
 0x11b   : > { %v945_v9 = vpop.f32.mrf.mxu2 }
 0x11c   : > { %v1104_v10 = vsel %vm1071_vm14, %v1041_v5, %v1088_v7  ;;  %v946_v11 = vadd.f32 %v945_v9, %v897_v8  ;;  %v1143_v7 = vadd.s32 %v2163_v2, %v1125_v61  ;;  %v1129_v61 = vadd.s32 120, %v2159_v63 }
 0x11d   : > { %v994_v12 = vpop.f32.mrf.mxu3  ;;  %v1203_v13 = vsel %vm1155_vm15, %v1104_v10, 0.0  ;;  %v898_v15 = vpop.f32.mrf.mxu1  ;;  %v1126_v10 = vadd.s32 96, %v2159_v63 }
 0x11e   : > { %v1219_v16 = vadd.f32 %v1218_v0, %v1203_v13  ;;  %v995_v17 = vadd.f32 %v994_v12, %v946_v11  ;;  %v899_v22 = vadd.f32 %v898_v15, %v850_v23  ;;  %vm1159_vm7 = vcmp.lt.s32.totalorder %v1143_v7, 600 }
 0x11f   : > { %v1045_v18 = vpop.f32.mrf.mxu0 }
 0x120   : > { %v1044_v20 = vadd.f32 %v1043_v4, %v995_v17 }
 0x122   : > { %vm1072_vm1 = vcmp.gt.f32.partialorder %v1044_v20, 0.0  ;;  %v1089_v21 = vmul.f32 %v2165_v3, %v1044_v20 }
 0x123   : > { %v947_v27 = vpop.f32.mrf.mxu2 }
 0x124   : > { %v1105_v28 = vsel %vm1072_vm1, %v1044_v20, %v1089_v21  ;;  %v948_v29 = vadd.f32 %v947_v27, %v899_v22 }
 0x125   : > { %v996_v25 = vpop.f32.mrf.mxu3  ;;  %v1204_v30 = vsel %vm1156_vm0, %v1105_v28, 0.0  ;;  %v901_v31 = vpop.f32.mrf.mxu1  ;;  %v1127_v28 = vadd.s32 104, %v2159_v63 }
 0x126   : > { %v1220_v32 = vadd.f32 %v1219_v16, %v1204_v30  ;;  %v997_v33 = vadd.f32 %v996_v25, %v948_v29  ;;  %v902_v42 = vadd.f32 %v901_v31, %v853_v35 }
 0x127   : > { %v1048_v37 = vpop.f32.mrf.mxu0 }
 0x128   : > { %v1046_v38 = vadd.f32 %v1045_v18, %v997_v33  ;;  %v1144_v18 = vadd.s32 %v2163_v2, %v1126_v10 }
 0x12a   : > { %vm1073_vm2 = vcmp.gt.f32.partialorder %v1046_v38, 0.0  ;;  %v1090_v41 = vmul.f32 %v2165_v3, %v1046_v38  ;;  %vm1160_vm8 = vcmp.lt.s32.totalorder %v1144_v18, 600 }
 0x12b   : > { %v950_v46 = vpop.f32.mrf.mxu2 }
 0x12c   : > { %v1106_v49 = vsel %vm1073_vm2, %v1046_v38, %v1090_v41  ;;  %v951_v51 = vadd.f32 %v950_v46, %v902_v42  ;;  %v1145_v38 = vadd.s32 %v2163_v2, %v1127_v28  ;;  %v1128_v41 = vadd.s32 112, %v2159_v63 }
 0x12d   : > { %v999_v52 = vpop.f32.mrf.mxu3  ;;  %v1205_v39 = vsel %vm1157_vm3, %v1106_v49, 0.0  ;;  %v903_v54 = vpop.f32.mrf.mxu1 }
 0x12e   : > { %v1221_v55 = vadd.f32 %v1220_v32, %v1205_v39  ;;  %v1000_v56 = vadd.f32 %v999_v52, %v951_v51  ;;  %v904_v60 = vadd.f32 %v903_v54, %v855_v43  ;;  %vm1161_vm11 = vcmp.lt.s32.totalorder %v1145_v38, 600 }
 0x12f   : > { %v1050_v57 = vpop.f32.mrf.mxu0 }
 0x130   : > { %v1049_v58 = vadd.f32 %v1048_v37, %v1000_v56 }
 0x132   : > { %vm1074_vm5 = vcmp.gt.f32.partialorder %v1049_v58, 0.0  ;;  %v1091_v59 = vmul.f32 %v2165_v3, %v1049_v58 }
 0x133   : > { %v952_v62 = vpop.f32.mrf.mxu2 }
 0x134   : > { %v1107_v0 = vsel %vm1074_vm5, %v1049_v58, %v1091_v59  ;;  %v953_v19 = vadd.f32 %v952_v62, %v904_v60 }
 0x135   : > { %v1001_v1 = vpop.f32.mrf.mxu3  ;;  %v1206_v4 = vsel %vm1158_vm4, %v1107_v0, 0.0  ;;  %v906_v45 = vpop.f32.mrf.mxu1 }
 0x136   : > { %v1222_v5 = vadd.f32 %v1221_v55, %v1206_v4  ;;  %v1002_v6 = vadd.f32 %v1001_v1, %v953_v19  ;;  %v907_v12 = vadd.f32 %v906_v45, %v858_v48  ;;  %v1146_v55 = vadd.s32 %v2163_v2, %v1128_v41 }
 0x137   : > { %v1053_v9 = vpop.f32.mrf.mxu0 }
 0x138   : > { %v1051_v8 = vadd.f32 %v1050_v57, %v1002_v6  ;;  %vm1162_vm12 = vcmp.lt.s32.totalorder %v1146_v55, 600  ;;  %v1147_v6 = vadd.s32 %v2163_v2, %v1129_v61 }
 0x13a   : > { %vm1075_vm6 = vcmp.gt.f32.partialorder %v1051_v8, 0.0  ;;  %v1092_v11 = vmul.f32 %v2165_v3, %v1051_v8  ;;  %vm1163_vm15 = vcmp.lt.s32.totalorder %v1147_v6, 600 }
 0x13b   : > { %v955_v13 = vpop.f32.mrf.mxu2 }
 0x13c   : > { %v1108_v14 = vsel %vm1075_vm6, %v1051_v8, %v1092_v11  ;;  %v956_v15 = vadd.f32 %v955_v13, %v907_v12 }
 0x13d   : > { %v1004_v16 = vpop.f32.mrf.mxu3  ;;  %v1207_v17 = vsel %vm1159_vm7, %v1108_v14, 0.0  ;;  %v908_v23 = vpop.f32.mrf.mxu1  ;;  %v1212_v14 = vld [vmem:[#allocation2] sm:$0x1] }
 0x13e   : > { %v1223_v20 = vadd.f32 %v1222_v5, %v1207_v17  ;;  %v1005_v21 = vadd.f32 %v1004_v16, %v956_v15  ;;  %v909_v27 = vadd.f32 %v908_v23, %v860_v24 }
 0x13f   : > { %v1055_v29 = vpop.f32.mrf.mxu0 }
 0x140   : > { %v1054_v22 = vadd.f32 %v1053_v9, %v1005_v21 }
 0x142   : > { %vm1076_vm9 = vcmp.gt.f32.partialorder %v1054_v22, 0.0  ;;  %v1093_v26 = vmul.f32 %v2165_v3, %v1054_v22 }
 0x143   : > { %v957_v25 = vpop.f32.mrf.mxu2 }
 0x144   : > { %v1109_v30 = vsel %vm1076_vm9, %v1054_v22, %v1093_v26  ;;  %v958_v31 = vadd.f32 %v957_v25, %v909_v27 }
 0x145   : > { %v1006_v32 = vpop.f32.mrf.mxu3  ;;  %v1208_v33 = vsel %vm1160_vm8, %v1109_v30, 0.0  ;;  %v911_v34 = vpop.f32.mrf.mxu1 }
 0x146   : > { %v1224_v37 = vadd.f32 %v1223_v20, %v1208_v33  ;;  %v1007_v35 = vadd.f32 %v1006_v32, %v958_v31  ;;  %v912_v46 = vadd.f32 %v911_v34, %v863_v36 }
 0x147   : > { %v1058_v54 = vpop.f32.mrf.mxu0 }
 0x148   : > { %v1056_v40 = vadd.f32 %v1055_v29, %v1007_v35 }
 0x14a   : > { %vm1077_vm10 = vcmp.gt.f32.partialorder %v1056_v40, 0.0  ;;  %v1094_v42 = vmul.f32 %v2165_v3, %v1056_v40 }
 0x14b   : > { %v960_v49 = vpop.f32.mrf.mxu2 }
 0x14c   : > { %v1110_v51 = vsel %vm1077_vm10, %v1056_v40, %v1094_v42  ;;  %v961_v52 = vadd.f32 %v960_v49, %v912_v46 }
 0x14d   : > { %v1009_v39 = vpop.f32.mrf.mxu3  ;;  %v1209_v53 = vsel %vm1161_vm11, %v1110_v51, 0.0  ;;  %v913_v43 = vpop.f32.mrf.mxu1 }
 0x14e   : > { %v1225_v56 = vadd.f32 %v1224_v37, %v1209_v53  ;;  %v1010_v57 = vadd.f32 %v1009_v39, %v961_v52  ;;  %v914_v60 = vadd.f32 %v913_v43, %v865_v44 }
 0x14f   : > { %v1060_v7 = vpop.f32.mrf.mxu0 }
 0x150   : > { %v1059_v58 = vadd.f32 %v1058_v54, %v1010_v57 }
 0x152   : > { %vm1078_vm13 = vcmp.gt.f32.partialorder %v1059_v58, 0.0  ;;  %v1095_v59 = vmul.f32 %v2165_v3, %v1059_v58 }
 0x153   : > { %v962_v62 = vpop.f32.mrf.mxu2 }
 0x154   : > { %v1111_v0 = vsel %vm1078_vm13, %v1059_v58, %v1095_v59  ;;  %v963_v19 = vadd.f32 %v962_v62, %v914_v60 }
 0x155   : > { %v1210_v1 = vsel %vm1162_vm12, %v1111_v0, 0.0  ;;  %v1011_v4 = vpop.f32.mrf.mxu3 }
 0x156   : > { %v1226_v45 = vadd.f32 %v1225_v56, %v1210_v1  ;;  %v1012_v5 = vadd.f32 %v1011_v4, %v963_v19 }
 0x158   : > { %v1061_v48 = vadd.f32 %v1060_v7, %v1012_v5 }
 0x15a   : > { %vm1079_vm14 = vcmp.gt.f32.partialorder %v1061_v48, 0.0  ;;  %v1096_v47 = vmul.f32 %v2165_v3, %v1061_v48 }
 0x15c   : > { %v1112_v50 = vsel %vm1079_vm14, %v1061_v48, %v1096_v47 }
 0x15d   : > { %v1211_v8 = vsel %vm1163_vm15, %v1112_v50, 0.0 }
 0x15e   : > { %v1227_v9 = vadd.f32 %v1226_v45, %v1211_v8 }
 0x160   : > { %v1228_v10 = vrot.slane %v1227_v9, 4 }
 0x162   : > { %v1229_v63 = vadd.f32 %v1228_v10, %v1227_v9 }
 0x164   : > { %v1230_v11 = vrot.slane %v1229_v63, 2 }
 0x166   : > { %v1231_v12 = vadd.f32 %v1230_v11, %v1229_v63 }
 0x168   : > { %v1232_v13 = vrot.slane %v1231_v12, 1 }
 0x16a   : > { %v1233_v15 = vadd.f32 %v1232_v13, %v1231_v12  ;;  %1239 = sbr.rel (%p1658_p9) target bundleno = 405 (0x195), region = 44 }
 0x16c   : > { %v1234_v16 = vadd.f32 %v1233_v15, %v1212_v14 }
 0x16e   : > { %1235 = vst [vmem:[#allocation2] sm:$0x1] %v1234_v16 }
 0x175   : > { %v1240_v2 = vld [vmem:[#allocation2] sm:$0x1] }
 0x176   : > { %v1659_v17 = vmul.f32 -0.0016666667, %v1240_v2 }
 0x178   : > { %v1243_v18 = vmul.f32 1.442695, %v1659_v17 }
 0x17a   : > { %1810 = vpow2.f32 %v1243_v18 }
 0x180   : > { %v1811_v3 = vpop.eup %1810 }
 0x181   : > { %v1245_v23 = vadd.f32 1.0, %v1811_v3 }
 0x183   : > { %1812 = vrcp.f32 %v1245_v23  ;;  %v1257_v24 = vand.u32 2147483648, %v1245_v23  ;;  %vm1251_vm0 = vweird.f32 %v1245_v23  ;;  %v1255_v26 = vand.u32 2147483647, %v1245_v23 }
 0x185   : > { %v1258_v28 = vor.u32 1.1754944e-38, %v1257_v24  ;;  %vm1256_vm3 = vcmp.eq.f32.partialorder %v1255_v26, 8.507059e+37 }
 0x189   : > { %v1813_v20 = vpop.eup %1812 }
 0x18a   : > { %v1247_v21 = vmul.f32 %v1813_v20, %v1245_v23  ;;  %vm1252_vm1 = vweird.f32 %v1813_v20 }
 0x18b   : > { %vm1253_vm2 = vmor %vm1251_vm0, %vm1252_vm1 }
 0x18c   : > { %v1248_v22 = vsub.f32 1.0, %v1247_v21 }
 0x18e   : > { %v1249_v27 = vmul.f32 %v1813_v20, %v1248_v22 }
 0x190   : > { %v1250_v29 = vadd.f32 %v1813_v20, %v1249_v27 }
 0x192   : > { %v1254_v25 = vsel %vm1253_vm2, %v1813_v20, %v1250_v29 }
 0x193   : > { %v1259_v30 = vsel %vm1256_vm3, %v1258_v28, %v1254_v25 }
 0x194   : > { %1261 = vst [vmem:[%s232_s5] sm:$0x1] %v1259_v30 }
 0x195 PF: > { %s15_s21 = sadd.s32 1, %s1852_s21   ;;  %s2266_s17 = smov %s1844_s19 }
 0x196   : > { %p12_p10 = scmp.ge.s32.totalorder %s15_s21, 12   ;;  %s2267_s18 = smov %s1848_s20 }
 0x197   : > { %s2268_s19 = smov %s2271_s3  ;;  %s2269_s20 = smov %s2275_s22 }
 0x198   :  { %14 = sbr.rel (!%p12_p10) target bundleno = 3 (0x3), region = 74 }

</bundles_post_ra>
